<compile_context>
chip_gen: v7x
topology: tpu7x:2x2x1
jax: 0.10.0
libtpu: 0.0.40
codegen_flags: <defaults>
</compile_context>

<pallas_src>
import jax
import jax.numpy as jnp
from jax import lax
from jax.experimental import pallas as pl
from jax.experimental.pallas import tpu as pltpu

# ----------------------------- problem sizes ------------------------------
N, L, D = 2, 8, 32          # batch (prompts), sequence length, transformer width
H = 4                       # attention heads
DH = D // H                 # head dim
FF = 4 * D                  # MLP hidden
LAYERS = 2                  # transformer depth
PROJ = 16                   # text_projection output dim
PROJ_PAD = 128              # lane-dense output width (sliced back to PROJ)
EPS = 1e-5


def _layernorm(h, g, b):
    mu = jnp.mean(h, axis=-1, keepdims=True)
    var = jnp.mean(jnp.square(h - mu), axis=-1, keepdims=True)
    return (h - mu) * lax.rsqrt(var + EPS) * g + b


# ------------------------------ fused kernel --------------------------------
def text_encoder_kernel(eot_ref,                       # SMEM (N,) int32 (scalar prefetch)
                        prompts_ref, pos_ref,
                        wq, wk, wv, bq, bk, bv, wo, bo,
                        ln1g, ln1b, ln2g, ln2b,
                        wfc, bfc, wpj, bpj,
                        lnfg, lnfb, wproj,
                        o_ref, x_sc):
    n = pl.program_id(0)                               # which sequence

    # x = prompt embedding + positional embedding (single broadcast add)
    x = prompts_ref[0] + pos_ref[...]                  # (L, D) f32

    # causal mask: built once, pre-broadcast over heads, reused by every layer
    rows = lax.broadcasted_iota(jnp.int32, (L, L), 0)
    cols = lax.broadcasted_iota(jnp.int32, (L, L), 1)
    causal = jnp.where(cols > rows, jnp.float32(-1e30), jnp.float32(0.0))
    causal_hb = jnp.broadcast_to(causal, (H, L, L))

    for li in range(LAYERS):                           # static unroll
        # -------- attention sublayer (pre-LN) --------
        h = _layernorm(x, ln1g[li], ln1b[li])          # f32
        hb = jnp.broadcast_to(h.astype(jnp.bfloat16), (H, L, D))
        # per-head projections as head-batched matmuls; 1/sqrt(DH) folded in wq/bq
        q = jnp.einsum('hld,hjd->hlj', hb, wq[li],
                       preferred_element_type=jnp.float32) + bq[li]   # (H,L,DH)
        k = jnp.einsum('hld,hjd->hlj', hb, wk[li],
                       preferred_element_type=jnp.float32) + bk[li]
        v = jnp.einsum('hld,hjd->hlj', hb, wv[li],
                       preferred_element_type=jnp.float32) + bv[li]

        s = jnp.einsum('hqj,hkj->hqk',
                       q.astype(jnp.bfloat16), k.astype(jnp.bfloat16),
                       preferred_element_type=jnp.float32) + causal_hb
        s = s - jnp.max(s, axis=-1, keepdims=True)
        e = jnp.exp(s)                                                 # f32 EUP
        p = e * pl.reciprocal(jnp.sum(e, axis=-1, keepdims=True), approx=True)
        a = jnp.einsum('hqk,hkj->hqj',
                       p.astype(jnp.bfloat16), v.astype(jnp.bfloat16),
                       preferred_element_type=jnp.float32)             # (H,L,DH)
        # output projection with the head-merge folded into the weight layout
        oh = jnp.einsum('hqj,hoj->hqo', a.astype(jnp.bfloat16), wo[li],
                        preferred_element_type=jnp.float32)            # (H,L,D)
        x = x + jnp.sum(oh, axis=0) + bo[li]

        # -------- MLP sublayer (QuickGELU), elementwise kept in f32 --------
        h = _layernorm(x, ln2g[li], ln2b[li])
        h = jnp.dot(h.astype(jnp.bfloat16), wfc[li],
                    preferred_element_type=jnp.float32) + bfc[li]
        h = h * jax.nn.sigmoid(1.702 * h)
        x = x + jnp.dot(h.astype(jnp.bfloat16), wpj[li],
                        preferred_element_type=jnp.float32) + bpj[li]

    # -------- EOT gather (scalar-addressed row select) + ln_final + proj --------
    x_sc[...] = x
    xe = x_sc[pl.ds(eot_ref[n], 1), :]                 # (1, D), dynamic sublane read
    xe = _layernorm(xe, lnfg[...], lnfb[...])
    o_ref[0] = jnp.dot(xe.astype(jnp.bfloat16), wproj[...],
                       preferred_element_type=jnp.float32)   # (1, PROJ_PAD) lane-dense


# ------------------------------- wrapper -------------------------------------
def _pack_params(params):
    """Reshape / pre-scale / pre-cast weights once in plain XLA (outside the kernel)."""
    scale = 1.0 / (DH ** 0.5)

    def stack(fn):
        return jnp.stack([fn(lp) for lp in params["layers"]], axis=0)

    def head_w(lp, off, sc=1.0):
        w = lp["w_qkv"][:, off:off + D]                       # (D, D)
        return w.reshape(D, H, DH).transpose(1, 2, 0) * sc    # (H, DH, D)

    def head_b(lp, off, sc=1.0):
        return lp["b_qkv"][0, off:off + D].reshape(H, 1, DH) * sc

    wq = stack(lambda lp: head_w(lp, 0, scale)).astype(jnp.bfloat16)
    wk = stack(lambda lp: head_w(lp, D)).astype(jnp.bfloat16)
    wv = stack(lambda lp: head_w(lp, 2 * D)).astype(jnp.bfloat16)
    bq = stack(lambda lp: head_b(lp, 0, scale))
    bk = stack(lambda lp: head_b(lp, D))
    bv = stack(lambda lp: head_b(lp, 2 * D))
    # w_o: (D, D) with rows grouped by head -> (H, D_out, DH) so head-merge is a
    # batched matmul + leading-axis sum inside the kernel.
    wo = stack(lambda lp: lp["w_o"].reshape(H, DH, D).transpose(0, 2, 1)
               ).astype(jnp.bfloat16)
    bo = stack(lambda lp: lp["b_o"])
    ln1g = stack(lambda lp: lp["ln1_g"]); ln1b = stack(lambda lp: lp["ln1_b"])
    ln2g = stack(lambda lp: lp["ln2_g"]); ln2b = stack(lambda lp: lp["ln2_b"])
    wfc = stack(lambda lp: lp["w_fc"]).astype(jnp.bfloat16)
    bfc = stack(lambda lp: lp["b_fc"])
    wpj = stack(lambda lp: lp["w_pj"]).astype(jnp.bfloat16)
    bpj = stack(lambda lp: lp["b_pj"])
    # lane-dense projection: zero-pad to PROJ_PAD lanes, slice back in wrapper
    wproj = jnp.zeros((D, PROJ_PAD), jnp.float32).at[:, :PROJ].set(
        params["w_text_proj"]).astype(jnp.bfloat16)

    return [params["pos"], wq, wk, wv, bq, bk, bv, wo, bo,
            ln1g, ln1b, ln2g, ln2b, wfc, bfc, wpj, bpj,
            params["lnf_g"], params["lnf_b"], wproj]


def text_encoder_forward(prompts, tokenized_prompts, params):
    # EOT positions (argmax of token ids), scalar-prefetched into SMEM.
    eot = jnp.argmax(tokenized_prompts, axis=-1).astype(jnp.int32)
    weights = _pack_params(params)

    def full_spec(w):
        return pl.BlockSpec(w.shape, lambda *_, nd=w.ndim: (0,) * nd)

    grid_spec = pltpu.PrefetchScalarGridSpec(
        num_scalar_prefetch=1,
        grid=(N,),                                        # one sequence per grid step
        in_specs=[pl.BlockSpec((1, L, D), lambda n, eot_ref: (n, 0, 0))]
                + [full_spec(w) for w in weights],
        out_specs=pl.BlockSpec((1, 1, PROJ_PAD), lambda n, eot_ref: (n, 0, 0)),
        scratch_shapes=[pltpu.VMEM((L, D), jnp.float32)],
    )
    out = pl.pallas_call(
        text_encoder_kernel,
        out_shape=jax.ShapeDtypeStruct((N, 1, PROJ_PAD), jnp.float32),
        grid_spec=grid_spec,
        compiler_params=pltpu.CompilerParams(
            dimension_semantics=("parallel",)),           # v7x: shard batch over TCs
    )(eot, prompts, *weights)
    return out[:, 0, :PROJ]


# -------------------------- synthetic parameters ----------------------------
def init_params(key):
    keys = jax.random.split(key, 2 + LAYERS)
    params = {
        "pos": 0.02 * jax.random.normal(keys[0], (L, D), jnp.float32),
        "lnf_g": jnp.ones((1, D), jnp.float32),
        "lnf_b": jnp.zeros((1, D), jnp.float32),
        "w_text_proj": 0.05 * jax.random.normal(keys[1], (D, PROJ), jnp.float32),
        "layers": [],
    }
    for i in range(LAYERS):
        k = jax.random.split(keys[2 + i], 6)
        params["layers"].append({
            "ln1_g": jnp.ones((1, D), jnp.float32),
            "ln1_b": jnp.zeros((1, D), jnp.float32),
            "w_qkv": 0.05 * jax.random.normal(k[0], (D, 3 * D), jnp.float32),
            "b_qkv": 0.01 * jax.random.normal(k[1], (1, 3 * D), jnp.float32),
            "w_o": 0.05 * jax.random.normal(k[2], (D, D), jnp.float32),
            "b_o": jnp.zeros((1, D), jnp.float32),
            "ln2_g": jnp.ones((1, D), jnp.float32),
            "ln2_b": jnp.zeros((1, D), jnp.float32),
            "w_fc": 0.05 * jax.random.normal(k[3], (D, FF), jnp.float32),
            "b_fc": 0.01 * jax.random.normal(k[4], (1, FF), jnp.float32),
            "w_pj": 0.05 * jax.random.normal(k[5], (FF, D), jnp.float32),
            "b_pj": jnp.zeros((1, D), jnp.float32),
        })
    return params


# ------------------------------- reference ----------------------------------
def reference_forward(prompts, tok, params):
    x = prompts + params["pos"][None]
    causal = jnp.where(jnp.arange(L)[None, :] > jnp.arange(L)[:, None],
                       -1e30, 0.0).astype(jnp.float32)
    for p in params["layers"]:
        h = _layernorm(x, p["ln1_g"], p["ln1_b"])
        qkv = h @ p["w_qkv"] + p["b_qkv"]
        q, k, v = jnp.split(qkv, 3, axis=-1)
        sh = lambda t: t.reshape(N, L, H, DH).transpose(0, 2, 1, 3)
        q, k, v = sh(q), sh(k), sh(v)
        s = jnp.einsum("nhqd,nhkd->nhqk", q, k) / (DH ** 0.5) + causal
        a = jnp.einsum("nhqk,nhkd->nhqd", jax.nn.softmax(s, axis=-1), v)
        a = a.transpose(0, 2, 1, 3).reshape(N, L, D)
        x = x + a @ p["w_o"] + p["b_o"]
        h = _layernorm(x, p["ln2_g"], p["ln2_b"])
        h = h @ p["w_fc"] + p["b_fc"]
        h = h * jax.nn.sigmoid(1.702 * h)
        x = x + h @ p["w_pj"] + p["b_pj"]
    eot = jnp.argmax(tok, axis=-1)
    xe = x[jnp.arange(N), eot]
    xe = _layernorm(xe, params["lnf_g"], params["lnf_b"])
    return xe @ params["w_text_proj"]


# --------------------------------- main --------------------------------------
if __name__ == "__main__":
    key = jax.random.PRNGKey(0)
    kp, kx = jax.random.split(key)
    params = init_params(kp)

    # prompts: learned prompt embeddings (N, L, D); tokenized prompts with EOT
    # (largest token id) at different positions per sequence.
    prompts = 0.02 * jax.random.normal(kx, (N, L, D), jnp.float32)
    tokenized_prompts = jnp.array(
        [[1, 5, 3, 49407, 0, 0, 0, 0],
         [1, 7, 9, 2, 6, 49407, 0, 0]], dtype=jnp.int32)

    out = text_encoder_forward(prompts, tokenized_prompts, params)
    out = jax.block_until_ready(out)

    ref = jax.block_until_ready(reference_forward(prompts, tokenized_prompts, params))
    assert out.shape == (N, PROJ) and out.dtype == jnp.float32
    assert bool(jnp.all(jnp.isfinite(out)))
    max_err = float(jnp.max(jnp.abs(out - ref)))
    # bf16 MXU inputs + approx softmax reciprocal -> slightly looser tolerance
    assert jnp.allclose(out, ref, atol=2e-2, rtol=5e-2), f"max_abs_err={max_err}"

    print("KERNEL_OK")
</pallas_src>

<mosaic_0001>
module attributes {stable_mosaic.version = 11 : i64} {
  func.func @text_encoder_kernel(%arg0: i32, %arg1: memref<2xi32, #tpu.memory_space<smem>>, %arg2: memref<1x8x32xf32, #tpu.memory_space<vmem>>, %arg3: memref<8x32xf32, #tpu.memory_space<vmem>>, %arg4: memref<2x4x8x32xbf16, #tpu.memory_space<vmem>>, %arg5: memref<2x4x8x32xbf16, #tpu.memory_space<vmem>>, %arg6: memref<2x4x8x32xbf16, #tpu.memory_space<vmem>>, %arg7: memref<2x4x1x8xf32, #tpu.memory_space<vmem>>, %arg8: memref<2x4x1x8xf32, #tpu.memory_space<vmem>>, %arg9: memref<2x4x1x8xf32, #tpu.memory_space<vmem>>, %arg10: memref<2x4x32x8xbf16, #tpu.memory_space<vmem>>, %arg11: memref<2x1x32xf32, #tpu.memory_space<vmem>>, %arg12: memref<2x1x32xf32, #tpu.memory_space<vmem>>, %arg13: memref<2x1x32xf32, #tpu.memory_space<vmem>>, %arg14: memref<2x1x32xf32, #tpu.memory_space<vmem>>, %arg15: memref<2x1x32xf32, #tpu.memory_space<vmem>>, %arg16: memref<2x32x128xbf16, #tpu.memory_space<vmem>>, %arg17: memref<2x1x128xf32, #tpu.memory_space<vmem>>, %arg18: memref<2x128x32xbf16, #tpu.memory_space<vmem>>, %arg19: memref<2x1x32xf32, #tpu.memory_space<vmem>>, %arg20: memref<1x32xf32, #tpu.memory_space<vmem>>, %arg21: memref<1x32xf32, #tpu.memory_space<vmem>>, %arg22: memref<32x128xbf16, #tpu.memory_space<vmem>>, %arg23: memref<1x1x128xf32, #tpu.memory_space<vmem>>, %arg24: memref<8x32xf32, #tpu.memory_space<vmem>>) attributes {dimension_semantics = [#tpu.dimension_semantics<parallel>], iteration_bounds = array<i64: 2>, scalar_prefetch = 1 : i64, scratch_operands = 1 : i64, tpu.core_type = #tpu.core_type<tc>, window_params = [{transform_indices = @transform_0, window_bounds = array<i64: 1, 8, 32>}, {pipeline_mode = #tpu.pipeline_mode<synchronous>, transform_indices = @transform_1, window_bounds = array<i64: 8, 32>}, {pipeline_mode = #tpu.pipeline_mode<synchronous>, transform_indices = @transform_2, window_bounds = array<i64: 2, 4, 8, 32>}, {pipeline_mode = #tpu.pipeline_mode<synchronous>, transform_indices = @transform_3, window_bounds = array<i64: 2, 4, 8, 32>}, {pipeline_mode = #tpu.pipeline_mode<synchronous>, transform_indices = @transform_4, window_bounds = array<i64: 2, 4, 8, 32>}, {pipeline_mode = #tpu.pipeline_mode<synchronous>, transform_indices = @transform_5, window_bounds = array<i64: 2, 4, 1, 8>}, {pipeline_mode = #tpu.pipeline_mode<synchronous>, transform_indices = @transform_6, window_bounds = array<i64: 2, 4, 1, 8>}, {pipeline_mode = #tpu.pipeline_mode<synchronous>, transform_indices = @transform_7, window_bounds = array<i64: 2, 4, 1, 8>}, {pipeline_mode = #tpu.pipeline_mode<synchronous>, transform_indices = @transform_8, window_bounds = array<i64: 2, 4, 32, 8>}, {pipeline_mode = #tpu.pipeline_mode<synchronous>, transform_indices = @transform_9, window_bounds = array<i64: 2, 1, 32>}, {pipeline_mode = #tpu.pipeline_mode<synchronous>, transform_indices = @transform_10, window_bounds = array<i64: 2, 1, 32>}, {pipeline_mode = #tpu.pipeline_mode<synchronous>, transform_indices = @transform_11, window_bounds = array<i64: 2, 1, 32>}, {pipeline_mode = #tpu.pipeline_mode<synchronous>, transform_indices = @transform_12, window_bounds = array<i64: 2, 1, 32>}, {pipeline_mode = #tpu.pipeline_mode<synchronous>, transform_indices = @transform_13, window_bounds = array<i64: 2, 1, 32>}, {pipeline_mode = #tpu.pipeline_mode<synchronous>, transform_indices = @transform_14, window_bounds = array<i64: 2, 32, 128>}, {pipeline_mode = #tpu.pipeline_mode<synchronous>, transform_indices = @transform_15, window_bounds = array<i64: 2, 1, 128>}, {pipeline_mode = #tpu.pipeline_mode<synchronous>, transform_indices = @transform_16, window_bounds = array<i64: 2, 128, 32>}, {pipeline_mode = #tpu.pipeline_mode<synchronous>, transform_indices = @transform_17, window_bounds = array<i64: 2, 1, 32>}, {pipeline_mode = #tpu.pipeline_mode<synchronous>, transform_indices = @transform_18, window_bounds = array<i64: 1, 32>}, {pipeline_mode = #tpu.pipeline_mode<synchronous>, transform_indices = @transform_19, window_bounds = array<i64: 1, 32>}, {pipeline_mode = #tpu.pipeline_mode<synchronous>, transform_indices = @transform_20, window_bounds = array<i64: 32, 128>}, {transform_indices = @transform_21, window_bounds = array<i64: 1, 1, 128>}]} {
    %c0 = arith.constant 0 : index
    %c0_0 = arith.constant 0 : index
    %c0_1 = arith.constant 0 : index
    %0 = vector.load %arg2[%c0, %c0_0, %c0_1] : memref<1x8x32xf32, #tpu.memory_space<vmem>>, vector<1x8x32xf32>
    %1 = vector.shape_cast %0 : vector<1x8x32xf32> to vector<8x32xf32>
    %c0_2 = arith.constant 0 : index
    %c0_3 = arith.constant 0 : index
    %2 = vector.load %arg3[%c0_2, %c0_3] : memref<8x32xf32, #tpu.memory_space<vmem>>, vector<8x32xf32>
    %3 = arith.addf %1, %2 : vector<8x32xf32>
    %4 = tpu.iota {dimensions = array<i32: 0>} : vector<8x8xi32>
    %5 = tpu.iota {dimensions = array<i32: 1>} : vector<8x8xi32>
    %6 = arith.cmpi sgt, %5, %4 : vector<8x8xi32>
    %cst = arith.constant -1.000000e+30 : f32
    %cst_4 = arith.constant 0.000000e+00 : f32
    %7 = vector.broadcast %cst : f32 to vector<8x8xf32>
    %8 = vector.broadcast %cst_4 : f32 to vector<8x8xf32>
    %9 = arith.select %6, %7, %8 : vector<8x8xi1>, vector<8x8xf32>
    %10 = vector.shape_cast %9 : vector<8x8xf32> to vector<1x8x8xf32>
    %11 = vector.broadcast %10 : vector<1x8x8xf32> to vector<4x8x8xf32>
    %c0_5 = arith.constant 0 : index
    %c0_6 = arith.constant 0 : index
    %c0_7 = arith.constant 0 : index
    %12 = vector.load %arg12[%c0_5, %c0_6, %c0_7] : memref<2x1x32xf32, #tpu.memory_space<vmem>>, vector<1x1x32xf32>
    %13 = vector.shape_cast %12 : vector<1x1x32xf32> to vector<1x32xf32>
    %c0_8 = arith.constant 0 : index
    %c0_9 = arith.constant 0 : index
    %c0_10 = arith.constant 0 : index
    %14 = vector.load %arg13[%c0_8, %c0_9, %c0_10] : memref<2x1x32xf32, #tpu.memory_space<vmem>>, vector<1x1x32xf32>
    %15 = vector.shape_cast %14 : vector<1x1x32xf32> to vector<1x32xf32>
    %cst_11 = arith.constant dense<0.000000e+00> : vector<8xf32>
    %16 = vector.multi_reduction <add>, %3, %cst_11 [1] : vector<8x32xf32> to vector<8xf32>
    %17 = vector.shape_cast %16 : vector<8xf32> to vector<8x1xf32>
    %cst_12 = arith.constant 3.200000e+01 : f32
    %18 = vector.broadcast %cst_12 : f32 to vector<8x1xf32>
    %19 = arith.divf %17, %18 : vector<8x1xf32>
    %20 = vector.broadcast %19 : vector<8x1xf32> to vector<8x32xf32>
    %21 = arith.subf %3, %20 : vector<8x32xf32>
    %22 = arith.mulf %21, %21 : vector<8x32xf32>
    %cst_13 = arith.constant dense<0.000000e+00> : vector<8xf32>
    %23 = vector.multi_reduction <add>, %22, %cst_13 [1] : vector<8x32xf32> to vector<8xf32>
    %24 = vector.shape_cast %23 : vector<8xf32> to vector<8x1xf32>
    %cst_14 = arith.constant 3.200000e+01 : f32
    %25 = vector.broadcast %cst_14 : f32 to vector<8x1xf32>
    %26 = arith.divf %24, %25 : vector<8x1xf32>
    %27 = vector.broadcast %19 : vector<8x1xf32> to vector<8x32xf32>
    %28 = arith.subf %3, %27 : vector<8x32xf32>
    %cst_15 = arith.constant 9.99999974E-6 : f32
    %29 = vector.broadcast %cst_15 : f32 to vector<8x1xf32>
    %30 = arith.addf %26, %29 : vector<8x1xf32>
    %31 = math.rsqrt %30 : vector<8x1xf32>
    %32 = vector.broadcast %31 : vector<8x1xf32> to vector<8x32xf32>
    %33 = arith.mulf %28, %32 : vector<8x32xf32>
    %34 = vector.broadcast %13 : vector<1x32xf32> to vector<8x32xf32>
    %35 = arith.mulf %33, %34 : vector<8x32xf32>
    %36 = vector.broadcast %15 : vector<1x32xf32> to vector<8x32xf32>
    %37 = arith.addf %35, %36 : vector<8x32xf32>
    %38 = arith.truncf %37 : vector<8x32xf32> to vector<8x32xbf16>
    %39 = vector.shape_cast %38 : vector<8x32xbf16> to vector<1x8x32xbf16>
    %40 = vector.broadcast %39 : vector<1x8x32xbf16> to vector<4x8x32xbf16>
    %c0_16 = arith.constant 0 : index
    %c0_17 = arith.constant 0 : index
    %c0_18 = arith.constant 0 : index
    %c0_19 = arith.constant 0 : index
    %41 = vector.load %arg4[%c0_16, %c0_17, %c0_18, %c0_19] : memref<2x4x8x32xbf16, #tpu.memory_space<vmem>>, vector<1x4x8x32xbf16>
    %42 = vector.shape_cast %41 : vector<1x4x8x32xbf16> to vector<4x8x32xbf16>
    "tpu.trace_start"() <{level = 10 : i32, message = "hld,hjd->hlj"}> : () -> ()
    %cst_20 = arith.constant dense<0.000000e+00> : vector<4x8x8xf32>
    %43 = tpu.matmul %40, %42, %cst_20 {dimension_numbers = #tpu.dot_dimension_numbers<[2], [2], [1], [1], [0, 0, 0, 1, 1, 1], [0], [0]>} : vector<4x8x32xbf16>, vector<4x8x32xbf16>, vector<4x8x8xf32> -> vector<4x8x8xf32>
    "tpu.trace_stop"() : () -> ()
    %c0_21 = arith.constant 0 : index
    %c0_22 = arith.constant 0 : index
    %c0_23 = arith.constant 0 : index
    %c0_24 = arith.constant 0 : index
    %44 = vector.load %arg7[%c0_21, %c0_22, %c0_23, %c0_24] : memref<2x4x1x8xf32, #tpu.memory_space<vmem>>, vector<1x4x1x8xf32>
    %45 = vector.shape_cast %44 : vector<1x4x1x8xf32> to vector<4x1x8xf32>
    %46 = vector.broadcast %45 : vector<4x1x8xf32> to vector<4x8x8xf32>
    %47 = arith.addf %43, %46 : vector<4x8x8xf32>
    %c0_25 = arith.constant 0 : index
    %c0_26 = arith.constant 0 : index
    %c0_27 = arith.constant 0 : index
    %c0_28 = arith.constant 0 : index
    %48 = vector.load %arg5[%c0_25, %c0_26, %c0_27, %c0_28] : memref<2x4x8x32xbf16, #tpu.memory_space<vmem>>, vector<1x4x8x32xbf16>
    %49 = vector.shape_cast %48 : vector<1x4x8x32xbf16> to vector<4x8x32xbf16>
    "tpu.trace_start"() <{level = 10 : i32, message = "hld,hjd->hlj"}> : () -> ()
    %cst_29 = arith.constant dense<0.000000e+00> : vector<4x8x8xf32>
    %50 = tpu.matmul %40, %49, %cst_29 {dimension_numbers = #tpu.dot_dimension_numbers<[2], [2], [1], [1], [0, 0, 0, 1, 1, 1], [0], [0]>} : vector<4x8x32xbf16>, vector<4x8x32xbf16>, vector<4x8x8xf32> -> vector<4x8x8xf32>
    "tpu.trace_stop"() : () -> ()
    %c0_30 = arith.constant 0 : index
    %c0_31 = arith.constant 0 : index
    %c0_32 = arith.constant 0 : index
    %c0_33 = arith.constant 0 : index
    %51 = vector.load %arg8[%c0_30, %c0_31, %c0_32, %c0_33] : memref<2x4x1x8xf32, #tpu.memory_space<vmem>>, vector<1x4x1x8xf32>
    %52 = vector.shape_cast %51 : vector<1x4x1x8xf32> to vector<4x1x8xf32>
    %53 = vector.broadcast %52 : vector<4x1x8xf32> to vector<4x8x8xf32>
    %54 = arith.addf %50, %53 : vector<4x8x8xf32>
    %c0_34 = arith.constant 0 : index
    %c0_35 = arith.constant 0 : index
    %c0_36 = arith.constant 0 : index
    %c0_37 = arith.constant 0 : index
    %55 = vector.load %arg6[%c0_34, %c0_35, %c0_36, %c0_37] : memref<2x4x8x32xbf16, #tpu.memory_space<vmem>>, vector<1x4x8x32xbf16>
    %56 = vector.shape_cast %55 : vector<1x4x8x32xbf16> to vector<4x8x32xbf16>
    "tpu.trace_start"() <{level = 10 : i32, message = "hld,hjd->hlj"}> : () -> ()
    %cst_38 = arith.constant dense<0.000000e+00> : vector<4x8x8xf32>
    %57 = tpu.matmul %40, %56, %cst_38 {dimension_numbers = #tpu.dot_dimension_numbers<[2], [2], [1], [1], [0, 0, 0, 1, 1, 1], [0], [0]>} : vector<4x8x32xbf16>, vector<4x8x32xbf16>, vector<4x8x8xf32> -> vector<4x8x8xf32>
    "tpu.trace_stop"() : () -> ()
    %c0_39 = arith.constant 0 : index
    %c0_40 = arith.constant 0 : index
    %c0_41 = arith.constant 0 : index
    %c0_42 = arith.constant 0 : index
    %58 = vector.load %arg9[%c0_39, %c0_40, %c0_41, %c0_42] : memref<2x4x1x8xf32, #tpu.memory_space<vmem>>, vector<1x4x1x8xf32>
    %59 = vector.shape_cast %58 : vector<1x4x1x8xf32> to vector<4x1x8xf32>
    %60 = vector.broadcast %59 : vector<4x1x8xf32> to vector<4x8x8xf32>
    %61 = arith.addf %57, %60 : vector<4x8x8xf32>
    %62 = arith.truncf %47 : vector<4x8x8xf32> to vector<4x8x8xbf16>
    %63 = arith.truncf %54 : vector<4x8x8xf32> to vector<4x8x8xbf16>
    "tpu.trace_start"() <{level = 10 : i32, message = "hqj,hkj->hqk"}> : () -> ()
    %cst_43 = arith.constant dense<0.000000e+00> : vector<4x8x8xf32>
    %64 = tpu.matmul %62, %63, %cst_43 {dimension_numbers = #tpu.dot_dimension_numbers<[2], [2], [1], [1], [0, 0, 0, 1, 1, 1], [0], [0]>} : vector<4x8x8xbf16>, vector<4x8x8xbf16>, vector<4x8x8xf32> -> vector<4x8x8xf32>
    "tpu.trace_stop"() : () -> ()
    %65 = arith.addf %64, %11 : vector<4x8x8xf32>
    %cst_44 = arith.constant dense<0xFF800000> : vector<4x8xf32>
    %66 = vector.multi_reduction <maximumf>, %65, %cst_44 [2] : vector<4x8x8xf32> to vector<4x8xf32>
    %67 = vector.shape_cast %66 : vector<4x8xf32> to vector<4x8x1xf32>
    %68 = vector.broadcast %67 : vector<4x8x1xf32> to vector<4x8x8xf32>
    %69 = arith.subf %65, %68 : vector<4x8x8xf32>
    %70 = math.exp %69 : vector<4x8x8xf32>
    %cst_45 = arith.constant dense<0.000000e+00> : vector<4x8xf32>
    %71 = vector.multi_reduction <add>, %70, %cst_45 [2] : vector<4x8x8xf32> to vector<4x8xf32>
    %72 = vector.shape_cast %71 : vector<4x8xf32> to vector<4x8x1xf32>
    %73 = tpu.reciprocal %72 {approx = true} : vector<4x8x1xf32> -> vector<4x8x1xf32>
    %74 = vector.broadcast %73 : vector<4x8x1xf32> to vector<4x8x8xf32>
    %75 = arith.mulf %70, %74 : vector<4x8x8xf32>
    %76 = arith.truncf %75 : vector<4x8x8xf32> to vector<4x8x8xbf16>
    %77 = arith.truncf %61 : vector<4x8x8xf32> to vector<4x8x8xbf16>
    "tpu.trace_start"() <{level = 10 : i32, message = "hqk,hkj->hqj"}> : () -> ()
    %cst_46 = arith.constant dense<0.000000e+00> : vector<4x8x8xf32>
    %78 = tpu.matmul %76, %77, %cst_46 {dimension_numbers = #tpu.dot_dimension_numbers<[2], [1], [1], [2], [0, 0, 0, 1, 1, 2], [0], [0]>} : vector<4x8x8xbf16>, vector<4x8x8xbf16>, vector<4x8x8xf32> -> vector<4x8x8xf32>
    "tpu.trace_stop"() : () -> ()
    %79 = arith.truncf %78 : vector<4x8x8xf32> to vector<4x8x8xbf16>
    %c0_47 = arith.constant 0 : index
    %c0_48 = arith.constant 0 : index
    %c0_49 = arith.constant 0 : index
    %c0_50 = arith.constant 0 : index
    %80 = vector.load %arg10[%c0_47, %c0_48, %c0_49, %c0_50] : memref<2x4x32x8xbf16, #tpu.memory_space<vmem>>, vector<1x4x32x8xbf16>
    %81 = vector.shape_cast %80 : vector<1x4x32x8xbf16> to vector<4x32x8xbf16>
    "tpu.trace_start"() <{level = 10 : i32, message = "hqj,hoj->hqo"}> : () -> ()
    %cst_51 = arith.constant dense<0.000000e+00> : vector<4x8x32xf32>
    %82 = tpu.matmul %79, %81, %cst_51 {dimension_numbers = #tpu.dot_dimension_numbers<[2], [2], [1], [1], [0, 0, 0, 1, 1, 1], [0], [0]>} : vector<4x8x8xbf16>, vector<4x32x8xbf16>, vector<4x8x32xf32> -> vector<4x8x32xf32>
    "tpu.trace_stop"() : () -> ()
    %cst_52 = arith.constant dense<0.000000e+00> : vector<8x32xf32>
    %83 = vector.multi_reduction <add>, %82, %cst_52 [0] : vector<4x8x32xf32> to vector<8x32xf32>
    %84 = arith.addf %3, %83 : vector<8x32xf32>
    %c0_53 = arith.constant 0 : index
    %c0_54 = arith.constant 0 : index
    %c0_55 = arith.constant 0 : index
    %85 = vector.load %arg11[%c0_53, %c0_54, %c0_55] : memref<2x1x32xf32, #tpu.memory_space<vmem>>, vector<1x1x32xf32>
    %86 = vector.shape_cast %85 : vector<1x1x32xf32> to vector<1x32xf32>
    %87 = vector.broadcast %86 : vector<1x32xf32> to vector<8x32xf32>
    %88 = arith.addf %84, %87 : vector<8x32xf32>
    %c0_56 = arith.constant 0 : index
    %c0_57 = arith.constant 0 : index
    %c0_58 = arith.constant 0 : index
    %89 = vector.load %arg14[%c0_56, %c0_57, %c0_58] : memref<2x1x32xf32, #tpu.memory_space<vmem>>, vector<1x1x32xf32>
    %90 = vector.shape_cast %89 : vector<1x1x32xf32> to vector<1x32xf32>
    %c0_59 = arith.constant 0 : index
    %c0_60 = arith.constant 0 : index
    %c0_61 = arith.constant 0 : index
    %91 = vector.load %arg15[%c0_59, %c0_60, %c0_61] : memref<2x1x32xf32, #tpu.memory_space<vmem>>, vector<1x1x32xf32>
    %92 = vector.shape_cast %91 : vector<1x1x32xf32> to vector<1x32xf32>
    %cst_62 = arith.constant dense<0.000000e+00> : vector<8xf32>
    %93 = vector.multi_reduction <add>, %88, %cst_62 [1] : vector<8x32xf32> to vector<8xf32>
    %94 = vector.shape_cast %93 : vector<8xf32> to vector<8x1xf32>
    %cst_63 = arith.constant 3.200000e+01 : f32
    %95 = vector.broadcast %cst_63 : f32 to vector<8x1xf32>
    %96 = arith.divf %94, %95 : vector<8x1xf32>
    %97 = vector.broadcast %96 : vector<8x1xf32> to vector<8x32xf32>
    %98 = arith.subf %88, %97 : vector<8x32xf32>
    %99 = arith.mulf %98, %98 : vector<8x32xf32>
    %cst_64 = arith.constant dense<0.000000e+00> : vector<8xf32>
    %100 = vector.multi_reduction <add>, %99, %cst_64 [1] : vector<8x32xf32> to vector<8xf32>
    %101 = vector.shape_cast %100 : vector<8xf32> to vector<8x1xf32>
    %cst_65 = arith.constant 3.200000e+01 : f32
    %102 = vector.broadcast %cst_65 : f32 to vector<8x1xf32>
    %103 = arith.divf %101, %102 : vector<8x1xf32>
    %104 = vector.broadcast %96 : vector<8x1xf32> to vector<8x32xf32>
    %105 = arith.subf %88, %104 : vector<8x32xf32>
    %cst_66 = arith.constant 9.99999974E-6 : f32
    %106 = vector.broadcast %cst_66 : f32 to vector<8x1xf32>
    %107 = arith.addf %103, %106 : vector<8x1xf32>
    %108 = math.rsqrt %107 : vector<8x1xf32>
    %109 = vector.broadcast %108 : vector<8x1xf32> to vector<8x32xf32>
    %110 = arith.mulf %105, %109 : vector<8x32xf32>
    %111 = vector.broadcast %90 : vector<1x32xf32> to vector<8x32xf32>
    %112 = arith.mulf %110, %111 : vector<8x32xf32>
    %113 = vector.broadcast %92 : vector<1x32xf32> to vector<8x32xf32>
    %114 = arith.addf %112, %113 : vector<8x32xf32>
    %115 = arith.truncf %114 : vector<8x32xf32> to vector<8x32xbf16>
    %c0_67 = arith.constant 0 : index
    %c0_68 = arith.constant 0 : index
    %c0_69 = arith.constant 0 : index
    %116 = vector.load %arg16[%c0_67, %c0_68, %c0_69] : memref<2x32x128xbf16, #tpu.memory_space<vmem>>, vector<1x32x128xbf16>
    %117 = vector.shape_cast %116 : vector<1x32x128xbf16> to vector<32x128xbf16>
    %cst_70 = arith.constant dense<0.000000e+00> : vector<8x128xf32>
    %118 = tpu.matmul %115, %117, %cst_70 {dimension_numbers = #tpu.dot_dimension_numbers<[1], [0], [0], [1], [0, 0, 1, 1], [], []>} : vector<8x32xbf16>, vector<32x128xbf16>, vector<8x128xf32> -> vector<8x128xf32>
    %c0_71 = arith.constant 0 : index
    %c0_72 = arith.constant 0 : index
    %c0_73 = arith.constant 0 : index
    %119 = vector.load %arg17[%c0_71, %c0_72, %c0_73] : memref<2x1x128xf32, #tpu.memory_space<vmem>>, vector<1x1x128xf32>
    %120 = vector.shape_cast %119 : vector<1x1x128xf32> to vector<1x128xf32>
    %121 = vector.broadcast %120 : vector<1x128xf32> to vector<8x128xf32>
    %122 = arith.addf %118, %121 : vector<8x128xf32>
    %cst_74 = arith.constant 1.702000e+00 : f32
    %123 = vector.broadcast %cst_74 : f32 to vector<8x128xf32>
    %124 = arith.mulf %123, %122 : vector<8x128xf32>
    %125 = arith.negf %124 : vector<8x128xf32>
    %126 = math.exp %125 : vector<8x128xf32>
    %cst_75 = arith.constant 1.000000e+00 : f32
    %127 = vector.broadcast %cst_75 : f32 to vector<8x128xf32>
    %128 = arith.addf %127, %126 : vector<8x128xf32>
    %129 = arith.divf %127, %128 : vector<8x128xf32>
    %130 = arith.mulf %122, %129 : vector<8x128xf32>
    %131 = arith.truncf %130 : vector<8x128xf32> to vector<8x128xbf16>
    %c0_76 = arith.constant 0 : index
    %c0_77 = arith.constant 0 : index
    %c0_78 = arith.constant 0 : index
    %132 = vector.load %arg18[%c0_76, %c0_77, %c0_78] : memref<2x128x32xbf16, #tpu.memory_space<vmem>>, vector<1x128x32xbf16>
    %133 = vector.shape_cast %132 : vector<1x128x32xbf16> to vector<128x32xbf16>
    %cst_79 = arith.constant dense<0.000000e+00> : vector<8x32xf32>
    %134 = tpu.matmul %131, %133, %cst_79 {dimension_numbers = #tpu.dot_dimension_numbers<[1], [0], [0], [1], [0, 0, 1, 1], [], []>} : vector<8x128xbf16>, vector<128x32xbf16>, vector<8x32xf32> -> vector<8x32xf32>
    %135 = arith.addf %88, %134 : vector<8x32xf32>
    %c0_80 = arith.constant 0 : index
    %c0_81 = arith.constant 0 : index
    %c0_82 = arith.constant 0 : index
    %136 = vector.load %arg19[%c0_80, %c0_81, %c0_82] : memref<2x1x32xf32, #tpu.memory_space<vmem>>, vector<1x1x32xf32>
    %137 = vector.shape_cast %136 : vector<1x1x32xf32> to vector<1x32xf32>
    %138 = vector.broadcast %137 : vector<1x32xf32> to vector<8x32xf32>
    %139 = arith.addf %135, %138 : vector<8x32xf32>
    %c1 = arith.constant 1 : index
    %c0_83 = arith.constant 0 : index
    %c0_84 = arith.constant 0 : index
    %140 = vector.load %arg12[%c1, %c0_83, %c0_84] : memref<2x1x32xf32, #tpu.memory_space<vmem>>, vector<1x1x32xf32>
    %141 = vector.shape_cast %140 : vector<1x1x32xf32> to vector<1x32xf32>
    %c1_85 = arith.constant 1 : index
    %c0_86 = arith.constant 0 : index
    %c0_87 = arith.constant 0 : index
    %142 = vector.load %arg13[%c1_85, %c0_86, %c0_87] : memref<2x1x32xf32, #tpu.memory_space<vmem>>, vector<1x1x32xf32>
    %143 = vector.shape_cast %142 : vector<1x1x32xf32> to vector<1x32xf32>
    %cst_88 = arith.constant dense<0.000000e+00> : vector<8xf32>
    %144 = vector.multi_reduction <add>, %139, %cst_88 [1] : vector<8x32xf32> to vector<8xf32>
    %145 = vector.shape_cast %144 : vector<8xf32> to vector<8x1xf32>
    %cst_89 = arith.constant 3.200000e+01 : f32
    %146 = vector.broadcast %cst_89 : f32 to vector<8x1xf32>
    %147 = arith.divf %145, %146 : vector<8x1xf32>
    %148 = vector.broadcast %147 : vector<8x1xf32> to vector<8x32xf32>
    %149 = arith.subf %139, %148 : vector<8x32xf32>
    %150 = arith.mulf %149, %149 : vector<8x32xf32>
    %cst_90 = arith.constant dense<0.000000e+00> : vector<8xf32>
    %151 = vector.multi_reduction <add>, %150, %cst_90 [1] : vector<8x32xf32> to vector<8xf32>
    %152 = vector.shape_cast %151 : vector<8xf32> to vector<8x1xf32>
    %cst_91 = arith.constant 3.200000e+01 : f32
    %153 = vector.broadcast %cst_91 : f32 to vector<8x1xf32>
    %154 = arith.divf %152, %153 : vector<8x1xf32>
    %155 = vector.broadcast %147 : vector<8x1xf32> to vector<8x32xf32>
    %156 = arith.subf %139, %155 : vector<8x32xf32>
    %cst_92 = arith.constant 9.99999974E-6 : f32
    %157 = vector.broadcast %cst_92 : f32 to vector<8x1xf32>
    %158 = arith.addf %154, %157 : vector<8x1xf32>
    %159 = math.rsqrt %158 : vector<8x1xf32>
    %160 = vector.broadcast %159 : vector<8x1xf32> to vector<8x32xf32>
    %161 = arith.mulf %156, %160 : vector<8x32xf32>
    %162 = vector.broadcast %141 : vector<1x32xf32> to vector<8x32xf32>
    %163 = arith.mulf %161, %162 : vector<8x32xf32>
    %164 = vector.broadcast %143 : vector<1x32xf32> to vector<8x32xf32>
    %165 = arith.addf %163, %164 : vector<8x32xf32>
    %166 = arith.truncf %165 : vector<8x32xf32> to vector<8x32xbf16>
    %167 = vector.shape_cast %166 : vector<8x32xbf16> to vector<1x8x32xbf16>
    %168 = vector.broadcast %167 : vector<1x8x32xbf16> to vector<4x8x32xbf16>
    %c1_93 = arith.constant 1 : index
    %c0_94 = arith.constant 0 : index
    %c0_95 = arith.constant 0 : index
    %c0_96 = arith.constant 0 : index
    %169 = vector.load %arg4[%c1_93, %c0_94, %c0_95, %c0_96] : memref<2x4x8x32xbf16, #tpu.memory_space<vmem>>, vector<1x4x8x32xbf16>
    %170 = vector.shape_cast %169 : vector<1x4x8x32xbf16> to vector<4x8x32xbf16>
    "tpu.trace_start"() <{level = 10 : i32, message = "hld,hjd->hlj"}> : () -> ()
    %cst_97 = arith.constant dense<0.000000e+00> : vector<4x8x8xf32>
    %171 = tpu.matmul %168, %170, %cst_97 {dimension_numbers = #tpu.dot_dimension_numbers<[2], [2], [1], [1], [0, 0, 0, 1, 1, 1], [0], [0]>} : vector<4x8x32xbf16>, vector<4x8x32xbf16>, vector<4x8x8xf32> -> vector<4x8x8xf32>
    "tpu.trace_stop"() : () -> ()
    %c1_98 = arith.constant 1 : index
    %c0_99 = arith.constant 0 : index
    %c0_100 = arith.constant 0 : index
    %c0_101 = arith.constant 0 : index
    %172 = vector.load %arg7[%c1_98, %c0_99, %c0_100, %c0_101] : memref<2x4x1x8xf32, #tpu.memory_space<vmem>>, vector<1x4x1x8xf32>
    %173 = vector.shape_cast %172 : vector<1x4x1x8xf32> to vector<4x1x8xf32>
    %174 = vector.broadcast %173 : vector<4x1x8xf32> to vector<4x8x8xf32>
    %175 = arith.addf %171, %174 : vector<4x8x8xf32>
    %c1_102 = arith.constant 1 : index
    %c0_103 = arith.constant 0 : index
    %c0_104 = arith.constant 0 : index
    %c0_105 = arith.constant 0 : index
    %176 = vector.load %arg5[%c1_102, %c0_103, %c0_104, %c0_105] : memref<2x4x8x32xbf16, #tpu.memory_space<vmem>>, vector<1x4x8x32xbf16>
    %177 = vector.shape_cast %176 : vector<1x4x8x32xbf16> to vector<4x8x32xbf16>
    "tpu.trace_start"() <{level = 10 : i32, message = "hld,hjd->hlj"}> : () -> ()
    %cst_106 = arith.constant dense<0.000000e+00> : vector<4x8x8xf32>
    %178 = tpu.matmul %168, %177, %cst_106 {dimension_numbers = #tpu.dot_dimension_numbers<[2], [2], [1], [1], [0, 0, 0, 1, 1, 1], [0], [0]>} : vector<4x8x32xbf16>, vector<4x8x32xbf16>, vector<4x8x8xf32> -> vector<4x8x8xf32>
    "tpu.trace_stop"() : () -> ()
    %c1_107 = arith.constant 1 : index
    %c0_108 = arith.constant 0 : index
    %c0_109 = arith.constant 0 : index
    %c0_110 = arith.constant 0 : index
    %179 = vector.load %arg8[%c1_107, %c0_108, %c0_109, %c0_110] : memref<2x4x1x8xf32, #tpu.memory_space<vmem>>, vector<1x4x1x8xf32>
    %180 = vector.shape_cast %179 : vector<1x4x1x8xf32> to vector<4x1x8xf32>
    %181 = vector.broadcast %180 : vector<4x1x8xf32> to vector<4x8x8xf32>
    %182 = arith.addf %178, %181 : vector<4x8x8xf32>
    %c1_111 = arith.constant 1 : index
    %c0_112 = arith.constant 0 : index
    %c0_113 = arith.constant 0 : index
    %c0_114 = arith.constant 0 : index
    %183 = vector.load %arg6[%c1_111, %c0_112, %c0_113, %c0_114] : memref<2x4x8x32xbf16, #tpu.memory_space<vmem>>, vector<1x4x8x32xbf16>
    %184 = vector.shape_cast %183 : vector<1x4x8x32xbf16> to vector<4x8x32xbf16>
    "tpu.trace_start"() <{level = 10 : i32, message = "hld,hjd->hlj"}> : () -> ()
    %cst_115 = arith.constant dense<0.000000e+00> : vector<4x8x8xf32>
    %185 = tpu.matmul %168, %184, %cst_115 {dimension_numbers = #tpu.dot_dimension_numbers<[2], [2], [1], [1], [0, 0, 0, 1, 1, 1], [0], [0]>} : vector<4x8x32xbf16>, vector<4x8x32xbf16>, vector<4x8x8xf32> -> vector<4x8x8xf32>
    "tpu.trace_stop"() : () -> ()
    %c1_116 = arith.constant 1 : index
    %c0_117 = arith.constant 0 : index
    %c0_118 = arith.constant 0 : index
    %c0_119 = arith.constant 0 : index
    %186 = vector.load %arg9[%c1_116, %c0_117, %c0_118, %c0_119] : memref<2x4x1x8xf32, #tpu.memory_space<vmem>>, vector<1x4x1x8xf32>
    %187 = vector.shape_cast %186 : vector<1x4x1x8xf32> to vector<4x1x8xf32>
    %188 = vector.broadcast %187 : vector<4x1x8xf32> to vector<4x8x8xf32>
    %189 = arith.addf %185, %188 : vector<4x8x8xf32>
    %190 = arith.truncf %175 : vector<4x8x8xf32> to vector<4x8x8xbf16>
    %191 = arith.truncf %182 : vector<4x8x8xf32> to vector<4x8x8xbf16>
    "tpu.trace_start"() <{level = 10 : i32, message = "hqj,hkj->hqk"}> : () -> ()
    %cst_120 = arith.constant dense<0.000000e+00> : vector<4x8x8xf32>
    %192 = tpu.matmul %190, %191, %cst_120 {dimension_numbers = #tpu.dot_dimension_numbers<[2], [2], [1], [1], [0, 0, 0, 1, 1, 1], [0], [0]>} : vector<4x8x8xbf16>, vector<4x8x8xbf16>, vector<4x8x8xf32> -> vector<4x8x8xf32>
    "tpu.trace_stop"() : () -> ()
    %193 = arith.addf %192, %11 : vector<4x8x8xf32>
    %cst_121 = arith.constant dense<0xFF800000> : vector<4x8xf32>
    %194 = vector.multi_reduction <maximumf>, %193, %cst_121 [2] : vector<4x8x8xf32> to vector<4x8xf32>
    %195 = vector.shape_cast %194 : vector<4x8xf32> to vector<4x8x1xf32>
    %196 = vector.broadcast %195 : vector<4x8x1xf32> to vector<4x8x8xf32>
    %197 = arith.subf %193, %196 : vector<4x8x8xf32>
    %198 = math.exp %197 : vector<4x8x8xf32>
    %cst_122 = arith.constant dense<0.000000e+00> : vector<4x8xf32>
    %199 = vector.multi_reduction <add>, %198, %cst_122 [2] : vector<4x8x8xf32> to vector<4x8xf32>
    %200 = vector.shape_cast %199 : vector<4x8xf32> to vector<4x8x1xf32>
    %201 = tpu.reciprocal %200 {approx = true} : vector<4x8x1xf32> -> vector<4x8x1xf32>
    %202 = vector.broadcast %201 : vector<4x8x1xf32> to vector<4x8x8xf32>
    %203 = arith.mulf %198, %202 : vector<4x8x8xf32>
    %204 = arith.truncf %203 : vector<4x8x8xf32> to vector<4x8x8xbf16>
    %205 = arith.truncf %189 : vector<4x8x8xf32> to vector<4x8x8xbf16>
    "tpu.trace_start"() <{level = 10 : i32, message = "hqk,hkj->hqj"}> : () -> ()
    %cst_123 = arith.constant dense<0.000000e+00> : vector<4x8x8xf32>
    %206 = tpu.matmul %204, %205, %cst_123 {dimension_numbers = #tpu.dot_dimension_numbers<[2], [1], [1], [2], [0, 0, 0, 1, 1, 2], [0], [0]>} : vector<4x8x8xbf16>, vector<4x8x8xbf16>, vector<4x8x8xf32> -> vector<4x8x8xf32>
    "tpu.trace_stop"() : () -> ()
    %207 = arith.truncf %206 : vector<4x8x8xf32> to vector<4x8x8xbf16>
    %c1_124 = arith.constant 1 : index
    %c0_125 = arith.constant 0 : index
    %c0_126 = arith.constant 0 : index
    %c0_127 = arith.constant 0 : index
    %208 = vector.load %arg10[%c1_124, %c0_125, %c0_126, %c0_127] : memref<2x4x32x8xbf16, #tpu.memory_space<vmem>>, vector<1x4x32x8xbf16>
    %209 = vector.shape_cast %208 : vector<1x4x32x8xbf16> to vector<4x32x8xbf16>
    "tpu.trace_start"() <{level = 10 : i32, message = "hqj,hoj->hqo"}> : () -> ()
    %cst_128 = arith.constant dense<0.000000e+00> : vector<4x8x32xf32>
    %210 = tpu.matmul %207, %209, %cst_128 {dimension_numbers = #tpu.dot_dimension_numbers<[2], [2], [1], [1], [0, 0, 0, 1, 1, 1], [0], [0]>} : vector<4x8x8xbf16>, vector<4x32x8xbf16>, vector<4x8x32xf32> -> vector<4x8x32xf32>
    "tpu.trace_stop"() : () -> ()
    %cst_129 = arith.constant dense<0.000000e+00> : vector<8x32xf32>
    %211 = vector.multi_reduction <add>, %210, %cst_129 [0] : vector<4x8x32xf32> to vector<8x32xf32>
    %212 = arith.addf %139, %211 : vector<8x32xf32>
    %c1_130 = arith.constant 1 : index
    %c0_131 = arith.constant 0 : index
    %c0_132 = arith.constant 0 : index
    %213 = vector.load %arg11[%c1_130, %c0_131, %c0_132] : memref<2x1x32xf32, #tpu.memory_space<vmem>>, vector<1x1x32xf32>
    %214 = vector.shape_cast %213 : vector<1x1x32xf32> to vector<1x32xf32>
    %215 = vector.broadcast %214 : vector<1x32xf32> to vector<8x32xf32>
    %216 = arith.addf %212, %215 : vector<8x32xf32>
    %c1_133 = arith.constant 1 : index
    %c0_134 = arith.constant 0 : index
    %c0_135 = arith.constant 0 : index
    %217 = vector.load %arg14[%c1_133, %c0_134, %c0_135] : memref<2x1x32xf32, #tpu.memory_space<vmem>>, vector<1x1x32xf32>
    %218 = vector.shape_cast %217 : vector<1x1x32xf32> to vector<1x32xf32>
    %c1_136 = arith.constant 1 : index
    %c0_137 = arith.constant 0 : index
    %c0_138 = arith.constant 0 : index
    %219 = vector.load %arg15[%c1_136, %c0_137, %c0_138] : memref<2x1x32xf32, #tpu.memory_space<vmem>>, vector<1x1x32xf32>
    %220 = vector.shape_cast %219 : vector<1x1x32xf32> to vector<1x32xf32>
    %cst_139 = arith.constant dense<0.000000e+00> : vector<8xf32>
    %221 = vector.multi_reduction <add>, %216, %cst_139 [1] : vector<8x32xf32> to vector<8xf32>
    %222 = vector.shape_cast %221 : vector<8xf32> to vector<8x1xf32>
    %cst_140 = arith.constant 3.200000e+01 : f32
    %223 = vector.broadcast %cst_140 : f32 to vector<8x1xf32>
    %224 = arith.divf %222, %223 : vector<8x1xf32>
    %225 = vector.broadcast %224 : vector<8x1xf32> to vector<8x32xf32>
    %226 = arith.subf %216, %225 : vector<8x32xf32>
    %227 = arith.mulf %226, %226 : vector<8x32xf32>
    %cst_141 = arith.constant dense<0.000000e+00> : vector<8xf32>
    %228 = vector.multi_reduction <add>, %227, %cst_141 [1] : vector<8x32xf32> to vector<8xf32>
    %229 = vector.shape_cast %228 : vector<8xf32> to vector<8x1xf32>
    %cst_142 = arith.constant 3.200000e+01 : f32
    %230 = vector.broadcast %cst_142 : f32 to vector<8x1xf32>
    %231 = arith.divf %229, %230 : vector<8x1xf32>
    %232 = vector.broadcast %224 : vector<8x1xf32> to vector<8x32xf32>
    %233 = arith.subf %216, %232 : vector<8x32xf32>
    %cst_143 = arith.constant 9.99999974E-6 : f32
    %234 = vector.broadcast %cst_143 : f32 to vector<8x1xf32>
    %235 = arith.addf %231, %234 : vector<8x1xf32>
    %236 = math.rsqrt %235 : vector<8x1xf32>
    %237 = vector.broadcast %236 : vector<8x1xf32> to vector<8x32xf32>
    %238 = arith.mulf %233, %237 : vector<8x32xf32>
    %239 = vector.broadcast %218 : vector<1x32xf32> to vector<8x32xf32>
    %240 = arith.mulf %238, %239 : vector<8x32xf32>
    %241 = vector.broadcast %220 : vector<1x32xf32> to vector<8x32xf32>
    %242 = arith.addf %240, %241 : vector<8x32xf32>
    %243 = arith.truncf %242 : vector<8x32xf32> to vector<8x32xbf16>
    %c1_144 = arith.constant 1 : index
    %c0_145 = arith.constant 0 : index
    %c0_146 = arith.constant 0 : index
    %244 = vector.load %arg16[%c1_144, %c0_145, %c0_146] : memref<2x32x128xbf16, #tpu.memory_space<vmem>>, vector<1x32x128xbf16>
    %245 = vector.shape_cast %244 : vector<1x32x128xbf16> to vector<32x128xbf16>
    %cst_147 = arith.constant dense<0.000000e+00> : vector<8x128xf32>
    %246 = tpu.matmul %243, %245, %cst_147 {dimension_numbers = #tpu.dot_dimension_numbers<[1], [0], [0], [1], [0, 0, 1, 1], [], []>} : vector<8x32xbf16>, vector<32x128xbf16>, vector<8x128xf32> -> vector<8x128xf32>
    %c1_148 = arith.constant 1 : index
    %c0_149 = arith.constant 0 : index
    %c0_150 = arith.constant 0 : index
    %247 = vector.load %arg17[%c1_148, %c0_149, %c0_150] : memref<2x1x128xf32, #tpu.memory_space<vmem>>, vector<1x1x128xf32>
    %248 = vector.shape_cast %247 : vector<1x1x128xf32> to vector<1x128xf32>
    %249 = vector.broadcast %248 : vector<1x128xf32> to vector<8x128xf32>
    %250 = arith.addf %246, %249 : vector<8x128xf32>
    %cst_151 = arith.constant 1.702000e+00 : f32
    %251 = vector.broadcast %cst_151 : f32 to vector<8x128xf32>
    %252 = arith.mulf %251, %250 : vector<8x128xf32>
    %253 = arith.negf %252 : vector<8x128xf32>
    %254 = math.exp %253 : vector<8x128xf32>
    %cst_152 = arith.constant 1.000000e+00 : f32
    %255 = vector.broadcast %cst_152 : f32 to vector<8x128xf32>
    %256 = arith.addf %255, %254 : vector<8x128xf32>
    %257 = arith.divf %255, %256 : vector<8x128xf32>
    %258 = arith.mulf %250, %257 : vector<8x128xf32>
    %259 = arith.truncf %258 : vector<8x128xf32> to vector<8x128xbf16>
    %c1_153 = arith.constant 1 : index
    %c0_154 = arith.constant 0 : index
    %c0_155 = arith.constant 0 : index
    %260 = vector.load %arg18[%c1_153, %c0_154, %c0_155] : memref<2x128x32xbf16, #tpu.memory_space<vmem>>, vector<1x128x32xbf16>
    %261 = vector.shape_cast %260 : vector<1x128x32xbf16> to vector<128x32xbf16>
    %cst_156 = arith.constant dense<0.000000e+00> : vector<8x32xf32>
    %262 = tpu.matmul %259, %261, %cst_156 {dimension_numbers = #tpu.dot_dimension_numbers<[1], [0], [0], [1], [0, 0, 1, 1], [], []>} : vector<8x128xbf16>, vector<128x32xbf16>, vector<8x32xf32> -> vector<8x32xf32>
    %263 = arith.addf %216, %262 : vector<8x32xf32>
    %c1_157 = arith.constant 1 : index
    %c0_158 = arith.constant 0 : index
    %c0_159 = arith.constant 0 : index
    %264 = vector.load %arg19[%c1_157, %c0_158, %c0_159] : memref<2x1x32xf32, #tpu.memory_space<vmem>>, vector<1x1x32xf32>
    %265 = vector.shape_cast %264 : vector<1x1x32xf32> to vector<1x32xf32>
    %266 = vector.broadcast %265 : vector<1x32xf32> to vector<8x32xf32>
    %267 = arith.addf %263, %266 : vector<8x32xf32>
    %c0_160 = arith.constant 0 : index
    %c0_161 = arith.constant 0 : index
    %268 = vector.load %arg24[%c0_160, %c0_161] : memref<8x32xf32, #tpu.memory_space<vmem>>, vector<8x32xf32>
    tpu.vector_store %arg24[%c0_160, %c0_161], %267 {strides = array<i32>} : memref<8x32xf32, #tpu.memory_space<vmem>>, vector<8x32xf32>,
    %269 = arith.index_cast %arg0 : i32 to index
    %270 = memref.load %arg1[%269] : memref<2xi32, #tpu.memory_space<smem>>
    %271 = arith.index_cast %270 : i32 to index
    %c0_162 = arith.constant 0 : index
    %272 = vector.load %arg24[%271, %c0_162] : memref<8x32xf32, #tpu.memory_space<vmem>>, vector<1x32xf32>
    %c0_163 = arith.constant 0 : index
    %c0_164 = arith.constant 0 : index
    %273 = vector.load %arg20[%c0_163, %c0_164] : memref<1x32xf32, #tpu.memory_space<vmem>>, vector<1x32xf32>
    %c0_165 = arith.constant 0 : index
    %c0_166 = arith.constant 0 : index
    %274 = vector.load %arg21[%c0_165, %c0_166] : memref<1x32xf32, #tpu.memory_space<vmem>>, vector<1x32xf32>
    %cst_167 = arith.constant dense<0.000000e+00> : vector<1xf32>
    %275 = vector.multi_reduction <add>, %272, %cst_167 [1] : vector<1x32xf32> to vector<1xf32>
    %276 = vector.shape_cast %275 : vector<1xf32> to vector<1x1xf32>
    %cst_168 = arith.constant 3.200000e+01 : f32
    %277 = vector.broadcast %cst_168 : f32 to vector<1x1xf32>
    %278 = arith.divf %276, %277 : vector<1x1xf32>
    %279 = vector.broadcast %278 : vector<1x1xf32> to vector<1x32xf32>
    %280 = arith.subf %272, %279 : vector<1x32xf32>
    %281 = arith.mulf %280, %280 : vector<1x32xf32>
    %cst_169 = arith.constant dense<0.000000e+00> : vector<1xf32>
    %282 = vector.multi_reduction <add>, %281, %cst_169 [1] : vector<1x32xf32> to vector<1xf32>
    %283 = vector.shape_cast %282 : vector<1xf32> to vector<1x1xf32>
    %cst_170 = arith.constant 3.200000e+01 : f32
    %284 = vector.broadcast %cst_170 : f32 to vector<1x1xf32>
    %285 = arith.divf %283, %284 : vector<1x1xf32>
    %286 = vector.broadcast %278 : vector<1x1xf32> to vector<1x32xf32>
    %287 = arith.subf %272, %286 : vector<1x32xf32>
    %cst_171 = arith.constant 9.99999974E-6 : f32
    %288 = vector.broadcast %cst_171 : f32 to vector<1x1xf32>
    %289 = arith.addf %285, %288 : vector<1x1xf32>
    %290 = math.rsqrt %289 : vector<1x1xf32>
    %291 = vector.broadcast %290 : vector<1x1xf32> to vector<1x32xf32>
    %292 = arith.mulf %287, %291 : vector<1x32xf32>
    %293 = arith.mulf %292, %273 : vector<1x32xf32>
    %294 = arith.addf %293, %274 : vector<1x32xf32>
    %295 = arith.truncf %294 : vector<1x32xf32> to vector<1x32xbf16>
    %c0_172 = arith.constant 0 : index
    %c0_173 = arith.constant 0 : index
    %296 = vector.load %arg22[%c0_172, %c0_173] : memref<32x128xbf16, #tpu.memory_space<vmem>>, vector<32x128xbf16>
    %cst_174 = arith.constant dense<0.000000e+00> : vector<1x128xf32>
    %297 = tpu.matmul %295, %296, %cst_174 {dimension_numbers = #tpu.dot_dimension_numbers<[1], [0], [0], [1], [0, 0, 1, 1], [], []>} : vector<1x32xbf16>, vector<32x128xbf16>, vector<1x128xf32> -> vector<1x128xf32>
    %c0_175 = arith.constant 0 : index
    %c0_176 = arith.constant 0 : index
    %c0_177 = arith.constant 0 : index
    %298 = vector.load %arg23[%c0_175, %c0_176, %c0_177] : memref<1x1x128xf32, #tpu.memory_space<vmem>>, vector<1x1x128xf32>
    %299 = vector.shape_cast %298 : vector<1x1x128xf32> to vector<1x128xf32>
    %300 = vector.shape_cast %297 : vector<1x128xf32> to vector<1x1x128xf32>
    tpu.vector_store %arg23[%c0_175, %c0_176, %c0_177], %300 {strides = array<i32>} : memref<1x1x128xf32, #tpu.memory_space<vmem>>, vector<1x1x128xf32>,
    return
  }
  func.func @transform_0(%arg0: i32, %arg1: memref<2xi32, #tpu.memory_space<smem>>) -> (i32, i32, i32) {
    %c0_i32 = arith.constant 0 : i32
    %c0_i32_0 = arith.constant 0 : i32
    %c0_i32_1 = arith.constant 0 : i32
    return %arg0, %c0_i32, %c0_i32_0 : i32, i32, i32
  }
  func.func @transform_1(%arg0: i32, %arg1: memref<2xi32, #tpu.memory_space<smem>>) -> (i32, i32) {
    %c0_i32 = arith.constant 0 : i32
    %c0_i32_0 = arith.constant 0 : i32
    %c0_i32_1 = arith.constant 0 : i32
    return %c0_i32, %c0_i32_0 : i32, i32
  }
  func.func @transform_2(%arg0: i32, %arg1: memref<2xi32, #tpu.memory_space<smem>>) -> (i32, i32, i32, i32) {
    %c0_i32 = arith.constant 0 : i32
    %c0_i32_0 = arith.constant 0 : i32
    %c0_i32_1 = arith.constant 0 : i32
    %c0_i32_2 = arith.constant 0 : i32
    %c0_i32_3 = arith.constant 0 : i32
    return %c0_i32, %c0_i32_0, %c0_i32_1, %c0_i32_2 : i32, i32, i32, i32
  }
  func.func @transform_3(%arg0: i32, %arg1: memref<2xi32, #tpu.memory_space<smem>>) -> (i32, i32, i32, i32) {
    %c0_i32 = arith.constant 0 : i32
    %c0_i32_0 = arith.constant 0 : i32
    %c0_i32_1 = arith.constant 0 : i32
    %c0_i32_2 = arith.constant 0 : i32
    %c0_i32_3 = arith.constant 0 : i32
    return %c0_i32, %c0_i32_0, %c0_i32_1, %c0_i32_2 : i32, i32, i32, i32
  }
  func.func @transform_4(%arg0: i32, %arg1: memref<2xi32, #tpu.memory_space<smem>>) -> (i32, i32, i32, i32) {
    %c0_i32 = arith.constant 0 : i32
    %c0_i32_0 = arith.constant 0 : i32
    %c0_i32_1 = arith.constant 0 : i32
    %c0_i32_2 = arith.constant 0 : i32
    %c0_i32_3 = arith.constant 0 : i32
    return %c0_i32, %c0_i32_0, %c0_i32_1, %c0_i32_2 : i32, i32, i32, i32
  }
  func.func @transform_5(%arg0: i32, %arg1: memref<2xi32, #tpu.memory_space<smem>>) -> (i32, i32, i32, i32) {
    %c0_i32 = arith.constant 0 : i32
    %c0_i32_0 = arith.constant 0 : i32
    %c0_i32_1 = arith.constant 0 : i32
    %c0_i32_2 = arith.constant 0 : i32
    %c0_i32_3 = arith.constant 0 : i32
    return %c0_i32, %c0_i32_0, %c0_i32_1, %c0_i32_2 : i32, i32, i32, i32
  }
  func.func @transform_6(%arg0: i32, %arg1: memref<2xi32, #tpu.memory_space<smem>>) -> (i32, i32, i32, i32) {
    %c0_i32 = arith.constant 0 : i32
    %c0_i32_0 = arith.constant 0 : i32
    %c0_i32_1 = arith.constant 0 : i32
    %c0_i32_2 = arith.constant 0 : i32
    %c0_i32_3 = arith.constant 0 : i32
    return %c0_i32, %c0_i32_0, %c0_i32_1, %c0_i32_2 : i32, i32, i32, i32
  }
  func.func @transform_7(%arg0: i32, %arg1: memref<2xi32, #tpu.memory_space<smem>>) -> (i32, i32, i32, i32) {
    %c0_i32 = arith.constant 0 : i32
    %c0_i32_0 = arith.constant 0 : i32
    %c0_i32_1 = arith.constant 0 : i32
    %c0_i32_2 = arith.constant 0 : i32
    %c0_i32_3 = arith.constant 0 : i32
    return %c0_i32, %c0_i32_0, %c0_i32_1, %c0_i32_2 : i32, i32, i32, i32
  }
  func.func @transform_8(%arg0: i32, %arg1: memref<2xi32, #tpu.memory_space<smem>>) -> (i32, i32, i32, i32) {
    %c0_i32 = arith.constant 0 : i32
    %c0_i32_0 = arith.constant 0 : i32
    %c0_i32_1 = arith.constant 0 : i32
    %c0_i32_2 = arith.constant 0 : i32
    %c0_i32_3 = arith.constant 0 : i32
    return %c0_i32, %c0_i32_0, %c0_i32_1, %c0_i32_2 : i32, i32, i32, i32
  }
  func.func @transform_9(%arg0: i32, %arg1: memref<2xi32, #tpu.memory_space<smem>>) -> (i32, i32, i32) {
    %c0_i32 = arith.constant 0 : i32
    %c0_i32_0 = arith.constant 0 : i32
    %c0_i32_1 = arith.constant 0 : i32
    %c0_i32_2 = arith.constant 0 : i32
    return %c0_i32, %c0_i32_0, %c0_i32_1 : i32, i32, i32
  }
  func.func @transform_10(%arg0: i32, %arg1: memref<2xi32, #tpu.memory_space<smem>>) -> (i32, i32, i32) {
    %c0_i32 = arith.constant 0 : i32
    %c0_i32_0 = arith.constant 0 : i32
    %c0_i32_1 = arith.constant 0 : i32
    %c0_i32_2 = arith.constant 0 : i32
    return %c0_i32, %c0_i32_0, %c0_i32_1 : i32, i32, i32
  }
  func.func @transform_11(%arg0: i32, %arg1: memref<2xi32, #tpu.memory_space<smem>>) -> (i32, i32, i32) {
    %c0_i32 = arith.constant 0 : i32
    %c0_i32_0 = arith.constant 0 : i32
    %c0_i32_1 = arith.constant 0 : i32
    %c0_i32_2 = arith.constant 0 : i32
    return %c0_i32, %c0_i32_0, %c0_i32_1 : i32, i32, i32
  }
  func.func @transform_12(%arg0: i32, %arg1: memref<2xi32, #tpu.memory_space<smem>>) -> (i32, i32, i32) {
    %c0_i32 = arith.constant 0 : i32
    %c0_i32_0 = arith.constant 0 : i32
    %c0_i32_1 = arith.constant 0 : i32
    %c0_i32_2 = arith.constant 0 : i32
    return %c0_i32, %c0_i32_0, %c0_i32_1 : i32, i32, i32
  }
  func.func @transform_13(%arg0: i32, %arg1: memref<2xi32, #tpu.memory_space<smem>>) -> (i32, i32, i32) {
    %c0_i32 = arith.constant 0 : i32
    %c0_i32_0 = arith.constant 0 : i32
    %c0_i32_1 = arith.constant 0 : i32
    %c0_i32_2 = arith.constant 0 : i32
    return %c0_i32, %c0_i32_0, %c0_i32_1 : i32, i32, i32
  }
  func.func @transform_14(%arg0: i32, %arg1: memref<2xi32, #tpu.memory_space<smem>>) -> (i32, i32, i32) {
    %c0_i32 = arith.constant 0 : i32
    %c0_i32_0 = arith.constant 0 : i32
    %c0_i32_1 = arith.constant 0 : i32
    %c0_i32_2 = arith.constant 0 : i32
    return %c0_i32, %c0_i32_0, %c0_i32_1 : i32, i32, i32
  }
  func.func @transform_15(%arg0: i32, %arg1: memref<2xi32, #tpu.memory_space<smem>>) -> (i32, i32, i32) {
    %c0_i32 = arith.constant 0 : i32
    %c0_i32_0 = arith.constant 0 : i32
    %c0_i32_1 = arith.constant 0 : i32
    %c0_i32_2 = arith.constant 0 : i32
    return %c0_i32, %c0_i32_0, %c0_i32_1 : i32, i32, i32
  }
  func.func @transform_16(%arg0: i32, %arg1: memref<2xi32, #tpu.memory_space<smem>>) -> (i32, i32, i32) {
    %c0_i32 = arith.constant 0 : i32
    %c0_i32_0 = arith.constant 0 : i32
    %c0_i32_1 = arith.constant 0 : i32
    %c0_i32_2 = arith.constant 0 : i32
    return %c0_i32, %c0_i32_0, %c0_i32_1 : i32, i32, i32
  }
  func.func @transform_17(%arg0: i32, %arg1: memref<2xi32, #tpu.memory_space<smem>>) -> (i32, i32, i32) {
    %c0_i32 = arith.constant 0 : i32
    %c0_i32_0 = arith.constant 0 : i32
    %c0_i32_1 = arith.constant 0 : i32
    %c0_i32_2 = arith.constant 0 : i32
    return %c0_i32, %c0_i32_0, %c0_i32_1 : i32, i32, i32
  }
  func.func @transform_18(%arg0: i32, %arg1: memref<2xi32, #tpu.memory_space<smem>>) -> (i32, i32) {
    %c0_i32 = arith.constant 0 : i32
    %c0_i32_0 = arith.constant 0 : i32
    %c0_i32_1 = arith.constant 0 : i32
    return %c0_i32, %c0_i32_0 : i32, i32
  }
  func.func @transform_19(%arg0: i32, %arg1: memref<2xi32, #tpu.memory_space<smem>>) -> (i32, i32) {
    %c0_i32 = arith.constant 0 : i32
    %c0_i32_0 = arith.constant 0 : i32
    %c0_i32_1 = arith.constant 0 : i32
    return %c0_i32, %c0_i32_0 : i32, i32
  }
  func.func @transform_20(%arg0: i32, %arg1: memref<2xi32, #tpu.memory_space<smem>>) -> (i32, i32) {
    %c0_i32 = arith.constant 0 : i32
    %c0_i32_0 = arith.constant 0 : i32
    %c0_i32_1 = arith.constant 0 : i32
    return %c0_i32, %c0_i32_0 : i32, i32
  }
  func.func @transform_21(%arg0: i32, %arg1: memref<2xi32, #tpu.memory_space<smem>>) -> (i32, i32, i32) {
    %c0_i32 = arith.constant 0 : i32
    %c0_i32_0 = arith.constant 0 : i32
    %c0_i32_1 = arith.constant 0 : i32
    return %arg0, %c0_i32, %c0_i32_0 : i32, i32, i32
  }
}

</mosaic_0001>

<bundles_post_ra>
// kernel: tpu_custom_call.1
= control target key start
LH: loop header
LB: loop body
LE: loop exit
PB: predicated region body
PF: predicated region fallthrough
CT: control target
= control target key end

     0   :  { %s5776_s0 = inlined_call_operand.vmem [shape: s32[2], index: 0, kind: input, shape index: {}]   ;;  %s5777_s1 = inlined_call_operand.vmem [shape: f32[2,8,32], index: 1, kind: input, shape index: {}]   ;;  %s5778_s2 = inlined_call_operand.vmem [shape: f32[8,32], index: 2, kind: input, shape index: {}]   ;;  %s5779_s3 = inlined_call_operand.vmem [shape: bf16[2,4,8,32], index: 3, kind: input, shape index: {}]   ;;  %s5780_s4 = inlined_call_operand.vmem [shape: bf16[2,4,8,32], index: 4, kind: input, shape index: {}]   ;;  %s5781_s5 = inlined_call_operand.vmem [shape: bf16[2,4,8,32], index: 5, kind: input, shape index: {}]   ;;  %s5782_s6 = inlined_call_operand.vmem [shape: f32[2,4,1,8], index: 6, kind: input, shape index: {}]   ;;  %s5783_s7 = inlined_call_operand.vmem [shape: f32[2,4,1,8], index: 7, kind: input, shape index: {}]   ;;  %s5784_s8 = inlined_call_operand.vmem [shape: f32[2,4,1,8], index: 8, kind: input, shape index: {}]   ;;  %s5785_s9 = inlined_call_operand.vmem [shape: bf16[2,4,32,8], index: 9, kind: input, shape index: {}]   ;;  %s5786_s10 = inlined_call_operand.vmem [shape: f32[2,1,32], index: 10, kind: input, shape index: {}]   ;;  %s5787_s11 = inlined_call_operand.vmem [shape: f32[2,1,32], index: 11, kind: input, shape index: {}]   ;;  %s5788_s12 = inlined_call_operand.vmem [shape: f32[2,1,32], index: 12, kind: input, shape index: {}]   ;;  %s5789_s13 = inlined_call_operand.vmem [shape: f32[2,1,32], index: 13, kind: input, shape index: {}]   ;;  %s5790_s14 = inlined_call_operand.vmem [shape: f32[2,1,32], index: 14, kind: input, shape index: {}]   ;;  %s5791_s15 = inlined_call_operand.vmem [shape: bf16[2,32,128], index: 15, kind: input, shape index: {}]   ;;  %s5792_s16 = inlined_call_operand.vmem [shape: f32[2,1,128], index: 16, kind: input, shape index: {}]   ;;  %s5793_s17 = inlined_call_operand.vmem [shape: bf16[2,128,32], index: 17, kind: input, shape index: {}]   ;;  %s5794_s18 = inlined_call_operand.vmem [shape: f32[2,1,32], index: 18, kind: input, shape index: {}]   ;;  %s5795_s19 = inlined_call_operand.vmem [shape: f32[1,32], index: 19, kind: input, shape index: {}]   ;;  %s5796_s20 = inlined_call_operand.vmem [shape: f32[1,32], index: 20, kind: input, shape index: {}]   ;;  %s5797_s21 = inlined_call_operand.vmem [shape: bf16[32,128], index: 21, kind: input, shape index: {}]   ;;  %s5798_s22 = inlined_call_operand.hbm [shape: f32[2,1,128], index: 22, kind: output, shape index: {}]  }
   0x1   :  { %5813 = sst [smem:[#allocation15_spill]] %s5776_s0 }
   0x2   :  { %5814 = sst [smem:[#allocation16_spill]] %s5777_s1  ;;  %s5821_s29 = sld [smem:[#allocation15_spill]] }
   0x3   :  { %5815 = sst [smem:[#allocation17_spill]] %s5778_s2 }
   0x4   :  { %5816 = sst [smem:[#allocation18_spill]] %s5779_s3 }
   0x5   :  { %5817 = sst [smem:[#allocation19_spill]] %s5780_s4 }
   0x6   :  { %5818 = sst [smem:[#allocation20_spill]] %s5781_s5 }
   0x7   :  { %5819 = sst [smem:[#allocation21_spill]] %s5782_s6 }
   0x8   :  { %5820 = sst [smem:[#allocation22_spill]] %s5792_s16  ;;  %s27_s16 = sshll.u32 %s5821_s29, 4  ;;  %s28_s16 = int_to_ptr.vmem [resolvable:$true] %s27_s16 }
   0x9   :  { %s4799_s30 = scalar_lea.vmem %s28_s16, 16  ;;  %p4804_p1 = scmp.lt.s32.totalorder %s28_s16, %s28_s16 }
   0xa   :  { %p4800_p0 = scmp.ne.s32.totalorder %s28_s16, %s4799_s30  ;;  %p4805_p2 = scmp.lt.s32.totalorder %s4799_s30, %s4799_s30 }
   0xc   :  { %p4806_p3 = por %p4805_p2, %p4804_p1 }
   0xe   :  { %p4807_p4 = pnand %p4806_p3, %p4800_p0 }
  0x10   :  { %4810 = shalt.err (!%p4807_p4)  }
  0x11   :  { %s4877_s4 = smov [#allocation4]  }
  0x12   :  { %30 = dma.vmem_to_smem %s28_s16, 16, %s4877_s4, [#allocation3] }
  0x13   :  { %4855 = dma.done.wait [#allocation3], 16 }
  0x14   :  { %4856 = vsyncadd [#allocation3], 4294967280 }
  0x15   :  { %32 = sfence }
  0x16   :  { %33 = vsyncpa [#allocation6], 0 }
  0x17   :  { %35 = vsyncpa [#allocation6 + $0x1], 0  ;;  %s4999_s0 = smov 0   ;;  %s5001_s23 = smov 0  }
  0x18   :  { %s5003_s1 = smov 0   ;;  %s5005_s5 = smov 0  }
  0x19 LB: > { %5822 = sst [smem:[#allocation9_spill]] %s4863_s0  ;;  %s5020_s16 = sadd.s32 4294967295, %s4875_s5   ;;  %s4875_s5 = sphi %s5005_s5, %s5841_s5   ;;  %s4871_s1 = sphi %s5003_s1, %s5843_s1   ;;  %s4867_s23 = sphi %s5001_s23, %s5845_s23   ;;  %s4863_s0 = sphi %s4999_s0, %s5844_s0  }
  0x1a   : > { %5823 = sst [smem:[#allocation10_spill]] %s4871_s1  ;;  %s3966_s24 = sadd.s32 4294967294, %s4875_s5  }
  0x1b   : > { %5824 = sst [smem:[#allocation11_spill]] %s4875_s5  ;;  %s5024_s6 = sadd.s32 1, %s4875_s5  }
  0x1c   : > { %5825 = sst [smem:[#allocation12_spill]] %s5024_s6  ;;  %s494_s25 = sadd.s32 1, %s4871_s1 }
  0x1d   : > { %s491_s26 = ssub.s32 %s4875_s5, %s5024_s6  ;;  %p504_p5 = scmp.ne.s32.totalorder %s4871_s1, %s4867_s23 }
  0x1e   : > { %p492_p6 = scmp.eq.s32.totalorder %s491_s26, 0  ;;  %p505_p7 = scmp.eq.s32.totalorder %s5020_s16, 1 }
  0x1f   : > { %p510_p8 = scmp.ne.s32.totalorder %s4867_s23, %s4863_s0  ;;  %p511_p9 = scmp.eq.s32.totalorder %s3966_s24, 1 }
  0x20   : > { %s5035_s2 = scalar_select %p492_p6, %s4871_s1, %s494_s25  }
  0x21   : > { %p5037_p10 = por %p505_p7, %p504_p5  ;;  %p5041_p11 = por %p511_p9, %p510_p8 }
  0x22   : > { %5826 = sst [smem:[#allocation13_spill]] %s5035_s2  ;;  %p3969_p12 = scmp.ge.s32.totalorder %s4875_s5, 1 }
  0x23   : > { %s5828_s3 = scalar_select %p5041_p11, 1, 0 }
  0x24   : > { %p596_p13 = scmp.lt.s32.totalorder %s4875_s5, 3 }
  0x25   : > { %5829 = sst [smem:[#allocation14_spill]] %s5828_s3 }
  0x26   : > { %p597_p0 = pnand %p3969_p12, %p596_p13 }
  0x27   : > { %p654_p1 = scmp.lt.s32.totalorder (!%p597_p0), %s5020_s16, 1  ;;  %s5830_s24 = sld [smem:[#allocation17_spill]] (!%p597_p0)  ;;  %vm670_vm0 = vcmask (!%p597_p0), 261120   ;;  %v4878_v11 = vmov (!%p597_p0), 0.0   ;;  %vm4879_vm1 = vmmov (!%p597_p0), 0   ;;  %vm1323_vm2 = vcmask (!%p597_p0), 64512  }
  0x28   : > { %600 = sbr.rel (%p597_p0) target bundleno = 5250 (0x1482), region = 104  ;;  %s5831_s2 = sld [smem:[#allocation16_spill]] (!%p597_p0)  ;;  %4301 = vmatprep.subr.bf16.mxu1 (!%p597_p0), %v4878_v11  ;;  %4313 = vmatprep.subr.bf16.mxu0 (!%p597_p0), %v4878_v11  ;;  %v3971_v18 = vld [vmem:[%s5787_s11] ss:$0 sm:$0xff] (!%p597_p0)  ;;  %vm1563_vm3 = vcmask (!%p597_p0), 1043456   ;;  %vm3820_vm5 = vcmask (!%p597_p0), 253952  }
  0x29   : > { %s5832_s4 = sld [smem:[#allocation18_spill]] (!%p597_p0)  ;;  %4303 = vmatprep.mubr.msk.bf16.mxu1 (!%p597_p0), %vm4879_vm1, %v4878_v11  ;;  %4315 = vmatprep.mubr.msk.bf16.mxu0 (!%p597_p0), %vm4879_vm1, %v4878_v11  ;;  %v3972_v20 = vld [vmem:[%s5788_s12] ss:$0 sm:$0xff] (!%p597_p0)  ;;  %s5833_s6 = sld [smem:[#allocation19_spill]] (!%p597_p0) }
  0x2a   : > { %v3981_v52 = vld [vmem:[%s5783_s7] ss:$0 sm:$0xff] (!%p597_p0)  ;;  %s5837_s26 = sld [smem:[#allocation22_spill]] (!%p597_p0)  ;;  %s652_s0 = sand.u32 (!%p597_p0), 1, %s4867_s23  }
  0x2b   : > { %s653_s5 = scalar_lea.vmem (!%p597_p0), [#allocation5], %s652_s0  ;;  %s4167_s3 = sshll.u32 (!%p597_p0), %s5020_s16, 4 }
  0x2d   : > { %v660_v0 = vld [vmem:[%s5830_s24] sm:$0xff] (!%p597_p0)  ;;  %s3815_s24 = sld [smem:[#allocation4 + %s5020_s16]] (!%p597_p0) }
  0x2f   : > { %s655_s28 = scalar_select %p654_p1, %s5020_s16, 1  ;;  %v700_v9 = vld [vmem:[%s5832_s4] sm:$0xf]  ;;  %v702_v10 = vld [vmem:[%s5832_s4 + $0x8] sm:$0xf] }
  0x30   : > { %v736_v12 = vsel %vm670_vm0, %v700_v9, 0  ;;  %v822_v13 = vsel %vm670_vm0, %v702_v10, 0  ;;  %v701_v22 = vld [vmem:[%s5832_s4 + $0x4] sm:$0xf]  ;;  %v907_v23 = vld [vmem:[%s5833_s6] sm:$0xf] }
  0x31   : > { %s3970_s29 = sshll.u32 %s655_s28, 3  ;;  %4302 = vmatpush3.bf16.xpose.msra.mxu1 %v736_v12  ;;  %4314 = vmatpush3.bf16.xpose.msra.mxu0 %v822_v13  ;;  %v779_v26 = vsel %vm670_vm0, %v701_v22, 0  ;;  %v940_v27 = vsel %vm670_vm0, %v907_v23, 0  ;;  %v703_v28 = vld [vmem:[%s5832_s4 + $0xc] sm:$0xf]  ;;  %s3910_s28 = sshll.u32 %s653_s5, 4  ;;  %s5731_s28 = int_to_ptr.vmem [resolvable:$true] %s3910_s28 }
  0x32   : > { %s657_s1 = scalar_lea.vmem %s5831_s2, %s3970_s29  ;;  %4307 = vmatprep.subr.bf16.mxu1 %v4878_v11  ;;  %4325 = vmatprep.subr.bf16.mxu0 %v4878_v11  ;;  %v909_v29 = vld [vmem:[%s5833_s6 + $0x8] sm:$0xf]  ;;  %v865_v30 = vsel %vm670_vm0, %v703_v28, 0  ;;  %v908_v32 = vld [vmem:[%s5833_s6 + $0x4] sm:$0xf]  ;;  %s5834_s29 = sld [smem:[#allocation20_spill]] }
  0x33   : > { %v659_v1 = vld [vmem:[%s657_s1] sm:$0xff]  ;;  %v1026_v31 = vsel %vm670_vm0, %v909_v29, 0  ;;  %v983_v34 = vsel %vm670_vm0, %v908_v32, 0  ;;  %v910_v36 = vld [vmem:[%s5833_s6 + $0xc] sm:$0xf]  ;;  %s5835_s1 = sld [smem:[#allocation21_spill]] }
  0x34   : > { %v5055_v2 = vadd.f32 %v660_v0, %v659_v1  ;;  %v1069_v38 = vsel %vm670_vm0, %v910_v36, 0  ;;  %v3983_v1 = vld [vmem:[%s5783_s7 + $0x2] ss:$0 sm:$0xff]  ;;  %s3816_s25 = scalar_lea.vmem [#allocation2], %s3815_s24  ;;  %s3898_s24 = scalar_lea.sflag [#allocation6], %s652_s0 }
  0x35   : > { %s4880_s16 = smov [#allocation5]  }
  0x36   : > { %v671_v3 = vsel %vm670_vm0, %v5055_v2, 0.0 }
  0x37   : > { %672 = vadd.xlane.f32.xlu0 %v671_v3 }
  0x38   : > { %v1111_v33 = vld [vmem:[%s5834_s29] sm:$0xf]  ;;  %v1113_v37 = vld [vmem:[%s5834_s29 + $0x8] sm:$0xf]  ;;  %v1112_v40 = vld [vmem:[%s5834_s29 + $0x4] sm:$0xf] }
  0x39   : > { %v1144_v35 = vsel %vm670_vm0, %v1111_v33, 0  ;;  %v1230_v39 = vsel %vm670_vm0, %v1113_v37, 0  ;;  %v1187_v41 = vsel %vm670_vm0, %v1112_v40, 0  ;;  %v1114_v42 = vld [vmem:[%s5834_s29 + $0xc] sm:$0xf]  ;;  %s5836_s2 = smov %s5835_s1 }
  0x3a   : > { %v1273_v43 = vsel %vm670_vm0, %v1114_v42, 0  ;;  %v3973_v63 = vld [vmem:[%s5835_s1] ss:$0 sm:$0xff]  ;;  %v3984_v37 = vld [vmem:[%s5783_s7 + $0x3] ss:$0 sm:$0xff]  ;;  %s5736_s1 = scalar_lea.hbm %s5798_s22, %s4167_s3 }
  0xc4   : > { %v673_v4 = vpop.xlane.xlu0 %672 }
  0xc5   : > { %v675_v5 = vmul.f32 0.03125, %v673_v4 }
  0xc7   : > { %v676_v6 = vsub.f32 %v5055_v2, %v675_v5 }
  0xc9   : > { %v677_v7 = vmul.f32 %v676_v6, %v676_v6 }
  0xcb   : > { %v678_v8 = vsel %vm670_vm0, %v677_v7, 0.0 }
  0xcc   : > { %679 = vadd.xlane.f32.xlu0 %v678_v8 }
 0x159   : > { %v680_v14 = vpop.xlane.xlu0 %679 }
 0x15a   : > { %v681_v15 = vmul.f32 0.03125, %v680_v14 }
 0x15c   : > { %v682_v16 = vadd.f32 1e-05, %v681_v15 }
 0x15e   : > { %4749 = vrsqrt.f32 %v682_v16  ;;  %v3975_v16 = vld [vmem:[%s5836_s2 + $0x2] ss:$0 sm:$0xff] }
 0x168   : > { %v4750_v17 = vpop.eup %4749 }
 0x169   : > { %v684_v19 = vmul.f32 %v4750_v17, %v676_v6 }
 0x16b   : > { %v691_v21 = vmul.f32 %v3971_v18, %v684_v19  ;;  %v3982_v18 = vld [vmem:[%s5783_s7 + $0x1] ss:$0 sm:$0xff]  ;;  %v3989_v19 = vld [vmem:[%s5784_s8] ss:$0 sm:$0xff] }
 0x16d   : > { %v698_v24 = vadd.f32 %v3972_v20, %v691_v21 }
 0x16f   : > { %v699_v25 = vpack.c.bf16 %v698_v24, %v698_v24 }
 0x171   : > { %4304 = vmatmul.mubr.msk.bf16.vlgmr.msra.gmra.mrb[0].mxu1 %vm670_vm0, %v699_v25  ;;  %4316 = vmatmul.mubr.msk.bf16.vlgmr.msra.gmra.mrb[0].mxu0 %vm670_vm0, %v699_v25 }
 0x172   : > { %4308 = vmatpush3.bf16.xpose.msra.mxu1 %v779_v26  ;;  %4326 = vmatpush3.bf16.xpose.msra.mxu0 %v940_v27 }
 0x173   : > { %4309 = vmatprep.mubr.msk.bf16.mxu1 %vm4879_vm1, %v4878_v11  ;;  %4327 = vmatprep.mubr.msk.bf16.mxu0 %vm4879_vm1, %v4878_v11 }
 0x174   : > { %4319 = vmatprep.subr.bf16.mxu1 %v4878_v11  ;;  %4337 = vmatprep.subr.bf16.mxu0 %v4878_v11 }
 0x179   : > { %4310 = vmatmul.mubr.msk.bf16.vlgmr.msra.gmra.mrb[4].mxu1 %vm670_vm0, %v699_v25  ;;  %4328 = vmatmul.mubr.msk.bf16.vlgmr.msra.gmra.mrb[4].mxu0 %vm670_vm0, %v699_v25 }
 0x17a   : > { %4320 = vmatpush3.bf16.xpose.msra.mxu1 %v865_v30  ;;  %4338 = vmatpush3.bf16.xpose.msra.mxu0 %v1026_v31 }
 0x17b   : > { %4321 = vmatprep.mubr.msk.bf16.mxu1 %vm4879_vm1, %v4878_v11  ;;  %4339 = vmatprep.mubr.msk.bf16.mxu0 %vm4879_vm1, %v4878_v11 }
 0x17c   : > { %4331 = vmatprep.subr.bf16.mxu1 %v4878_v11  ;;  %4349 = vmatprep.subr.bf16.mxu0 %v4878_v11 }
 0x181   : > { %4322 = vmatmul.mubr.msk.bf16.vlgmr.msra.gmra.mrb[8].mxu1 %vm670_vm0, %v699_v25  ;;  %4340 = vmatmul.mubr.msk.bf16.vlgmr.msra.gmra.mrb[8].mxu0 %vm670_vm0, %v699_v25 }
 0x182   : > { %4332 = vmatpush3.bf16.xpose.msra.mxu1 %v983_v34  ;;  %4350 = vmatpush3.bf16.xpose.msra.mxu0 %v1144_v35  ;;  %v3974_v34 = vld [vmem:[%s5836_s2 + $0x1] ss:$0 sm:$0xff] }
 0x183   : > { %4333 = vmatprep.mubr.msk.bf16.mxu1 %vm4879_vm1, %v4878_v11  ;;  %4351 = vmatprep.mubr.msk.bf16.mxu0 %vm4879_vm1, %v4878_v11 }
 0x184   : > { %4343 = vmatprep.subr.bf16.mxu1 %v4878_v11  ;;  %4361 = vmatprep.subr.bf16.mxu0 %v4878_v11 }
 0x189   : > { %4334 = vmatmul.mubr.msk.bf16.vlgmr.msra.gmra.mrb[12].mxu1 %vm670_vm0, %v699_v25  ;;  %4352 = vmatmul.mubr.msk.bf16.vlgmr.msra.gmra.mrb[12].mxu0 %vm670_vm0, %v699_v25 }
 0x18a   : > { %4344 = vmatpush3.bf16.xpose.msra.mxu1 %v1069_v38  ;;  %4362 = vmatpush3.bf16.xpose.msra.mxu0 %v1230_v39 }
 0x18b   : > { %4345 = vmatprep.mubr.msk.bf16.mxu1 %vm4879_vm1, %v4878_v11  ;;  %4363 = vmatprep.mubr.msk.bf16.mxu0 %vm4879_vm1, %v4878_v11 }
 0x18c   : > { %4355 = vmatprep.subr.bf16.mxu1 %v4878_v11  ;;  %4373 = vmatprep.subr.bf16.mxu0 %v4878_v11 }
 0x191   : > { %4346 = vmatmul.mubr.msk.bf16.vlgmr.msra.gmra.mrb[16].mxu1 %vm670_vm0, %v699_v25  ;;  %4364 = vmatmul.mubr.msk.bf16.vlgmr.msra.gmra.mrb[16].mxu0 %vm670_vm0, %v699_v25 }
 0x192   : > { %4356 = vmatpush3.bf16.xpose.msra.mxu1 %v1187_v41  ;;  %4357 = vmatprep.mubr.msk.bf16.mxu1 %vm4879_vm1, %v4878_v11 }
 0x193   : > { %4367 = vmatprep.subr.bf16.mxu1 %v4878_v11  ;;  %4375 = vmatprep.mubr.msk.bf16.mxu0 %vm4879_vm1, %v4878_v11 }
 0x199   : > { %4358 = vmatmul.mubr.msk.bf16.vlgmr.msra.gmra.mrb[20].mxu1 %vm670_vm0, %v699_v25 }
 0x19a   : > { %4368 = vmatpush3.bf16.xpose.msra.mxu1 %v1273_v43  ;;  %4369 = vmatprep.mubr.msk.bf16.mxu1 %vm4879_vm1, %v4878_v11 }
 0x19b   : > { %4379 = vmatprep.subr.bf16.mxu1 %v4878_v11 }
 0x1a1   : > { %4370 = vmatmul.mubr.msk.bf16.vlgmr.msra.gmra.mrb[24].mxu1 %vm670_vm0, %v699_v25 }
 0x1a2   : > { %4381 = vmatprep.mubr.msk.bf16.mxu1 %vm4879_vm1, %v4878_v11 }
 0x244   : > { %v772_v44 = vpop.f32.mrb[0].mxu1  ;;  %v858_v45 = vpop.f32.mrb[0].mxu0 }
 0x245   : > { %v4305_v46 = vpop.f32.mrb[1].mxu1  ;;  %v4317_v47 = vpop.f32.mrb[1].mxu0  ;;  %v773_v3 = vadd.f32 %v3973_v63, %v772_v44  ;;  %v859_v20 = vadd.f32 %v3975_v16, %v858_v45 }
 0x246   : > { %v775_v48 = vpop.f32.mrb[2].mxu1  ;;  %v861_v49 = vpop.f32.mrb[2].mxu0 }
 0x247   : > { %v4306_v50 = vpop.f32.mrb[3].mxu1  ;;  %v4318_v51 = vpop.f32.mrb[3].mxu0  ;;  %v1315_v12 = vpack.c.bf16 %v773_v3, %v773_v3  ;;  %v1317_v29 = vpack.c.bf16 %v859_v20, %v859_v20  ;;  %v662_v3 = vlaneseq }
 0x248   : > { %v3976_v50 = vld [vmem:[%s5836_s2 + $0x3] ss:$0 sm:$0xff] }
 0x24c   : > { %v815_v53 = vpop.f32.mrb[4].mxu1  ;;  %v976_v54 = vpop.f32.mrb[4].mxu0 }
 0x24d   : > { %v977_v55 = vadd.f32 %v3981_v52, %v976_v54  ;;  %v4311_v56 = vpop.f32.mrb[5].mxu1  ;;  %v4329_v57 = vpop.f32.mrb[5].mxu0  ;;  %v816_v38 = vadd.f32 %v3974_v34, %v815_v53  ;;  %v3990_v52 = vld [vmem:[%s5784_s8 + $0x1] ss:$0 sm:$0xff] }
 0x24e   : > { %v818_v58 = vpop.f32.mrb[6].mxu1  ;;  %v979_v59 = vpop.f32.mrb[6].mxu0 }
 0x24f   : > { %v1319_v60 = vpack.c.bf16 %v977_v55, %v977_v55  ;;  %v4312_v61 = vpop.f32.mrb[7].mxu1  ;;  %v4330_v62 = vpop.f32.mrb[7].mxu0  ;;  %v1316_v46 = vpack.c.bf16 %v816_v38, %v816_v38 }
 0x251   : > { %v1328_v0 = vsel %vm1323_vm2, %v1319_v60, 0 }
 0x252   : > { %4374 = vmatpush3.bf16.xpose.msra.mxu0 %v1328_v0 }
 0x253   : > { %4385 = vmatprep.subr.bf16.mxu0 %v4878_v11 }
 0x254   : > { %v901_v4 = vpop.f32.mrb[8].mxu1  ;;  %v1062_v5 = vpop.f32.mrb[8].mxu0 }
 0x255   : > { %v1063_v6 = vadd.f32 %v3983_v1, %v1062_v5  ;;  %v4323_v7 = vpop.f32.mrb[9].mxu1  ;;  %v4341_v8 = vpop.f32.mrb[9].mxu0  ;;  %v902_v53 = vadd.f32 %v3976_v50, %v901_v4  ;;  %v663_v4 = vshrl.u32 %v662_v3, 7  ;;  %v665_v5 = vand.u32 127, %v662_v3  ;;  %v3992_v3 = vld [vmem:[%s5784_s8 + $0x3] ss:$0 sm:$0xff] }
 0x256   : > { %v904_v9 = vpop.f32.mrb[10].mxu1  ;;  %v1065_v10 = vpop.f32.mrb[10].mxu0 }
 0x257   : > { %v1321_v13 = vpack.c.bf16 %v1063_v6, %v1063_v6  ;;  %v4324_v14 = vpop.f32.mrb[11].mxu1  ;;  %v4342_v15 = vpop.f32.mrb[11].mxu0  ;;  %v1318_v58 = vpack.c.bf16 %v902_v53, %v902_v53  ;;  %vm666_vm4 = vcmp.gt.s32.totalorder %v665_v5, %v663_v4 }
 0x258   : > { %v5228_v6 = vsel %vm666_vm4, -1e+30, %v4878_v11 }
 0x259   : > { %v1420_v17 = vsel %vm1323_vm2, %v1321_v13, 0  ;;  %4376 = vmatmul.mubr.msk.bf16.vlgmr.msra.gmra.mrb[20].mxu0 %vm1323_vm2, %v1315_v12 }
 0x25a   : > { %4386 = vmatpush3.bf16.xpose.msra.mxu0 %v1420_v17  ;;  %4387 = vmatprep.mubr.msk.bf16.mxu0 %vm4879_vm1, %v4878_v11 }
 0x25b   : > { %4397 = vmatprep.subr.bf16.mxu0 %v4878_v11 }
 0x25c   : > { %v1019_v21 = vpop.f32.mrb[12].mxu1  ;;  %v1180_v22 = vpop.f32.mrb[12].mxu0 }
 0x25d   : > { %v1020_v23 = vadd.f32 %v3982_v18, %v1019_v21  ;;  %v1181_v24 = vadd.f32 %v3989_v19, %v1180_v22  ;;  %v4335_v25 = vpop.f32.mrb[13].mxu1  ;;  %v4353_v26 = vpop.f32.mrb[13].mxu0 }
 0x25e   : > { %v1022_v27 = vpop.f32.mrb[14].mxu1  ;;  %v1183_v28 = vpop.f32.mrb[14].mxu0 }
 0x25f   : > { %v1320_v30 = vpack.c.bf16 %v1020_v23, %v1020_v23  ;;  %v1556_v31 = vpack.c.bf16 %v1181_v24, %v1181_v24  ;;  %v4336_v32 = vpop.f32.mrb[15].mxu1  ;;  %v4354_v33 = vpop.f32.mrb[15].mxu0 }
 0x261   : > { %v1374_v35 = vsel %vm1323_vm2, %v1320_v30, 0  ;;  %v1565_v36 = vsel %vm1563_vm3, %v1556_v31, 0  ;;  %4388 = vmatmul.mubr.msk.bf16.vlgmr.msra.gmra.mrb[24].mxu0 %vm1323_vm2, %v1317_v29 }
 0x262   : > { %4380 = vmatpush3.bf16.xpose.msra.mxu1 %v1374_v35  ;;  %4398 = vmatpush3.bf16.msra.mxu0 %v1565_v36 }
 0x263   : > { %4391 = vmatprep.subr.bf16.mxu1 %v4878_v11  ;;  %4399 = vmatprep.mubr.msk.bf16.mxu0 %vm4879_vm1, %v4878_v11 }
 0x264   : > { %v1105_v39 = vpop.f32.mrb[16].mxu1  ;;  %v5206_v40 = vpop.f32.mrb[16].mxu0  ;;  %4409 = vmatprep.subr.bf16.mxu0 %v4878_v11 }
 0x265   : > { %v1106_v41 = vadd.f32 %v3984_v37, %v1105_v39  ;;  %v4347_v42 = vpop.f32.mrb[17].mxu1  ;;  %v4365_v43 = vpop.f32.mrb[17].mxu0 }
 0x266   : > { %v1108_v44 = vpop.f32.mrb[18].mxu1  ;;  %v1269_v45 = vpop.f32.mrb[18].mxu0 }
 0x267   : > { %v1322_v47 = vpack.c.bf16 %v1106_v41, %v1106_v41  ;;  %v4348_v48 = vpop.f32.mrb[19].mxu1  ;;  %v4366_v49 = vpop.f32.mrb[19].mxu0 }
 0x269   : > { %v1466_v51 = vsel %vm1323_vm2, %v1322_v47, 0  ;;  %4382 = vmatmul.mubr.msk.bf16.vlgmr.msra.gmra.mrb[28].mxu1 %vm1323_vm2, %v1316_v46 }
 0x26a   : > { %4392 = vmatpush3.bf16.xpose.msra.mxu1 %v1466_v51  ;;  %4393 = vmatprep.mubr.msk.bf16.mxu1 %vm4879_vm1, %v4878_v11 }
 0x26b   : > { %4403 = vmatprep.subr.bf16.mxu1 %v4878_v11 }
 0x26c   : > { %v1223_v54 = vpop.f32.mrb[20].mxu1 }
 0x26d   : > { %v1224_v55 = vadd.f32 %v3990_v52, %v1223_v54  ;;  %v4359_v56 = vpop.f32.mrb[21].mxu1  ;;  %v3991_v54 = vld [vmem:[%s5784_s8 + $0x2] ss:$0 sm:$0xff] }
 0x26e   : > { %v1226_v57 = vpop.f32.mrb[22].mxu1 }
 0x26f   : > { %v1557_v59 = vpack.c.bf16 %v1224_v55, %v1224_v55  ;;  %v4360_v60 = vpop.f32.mrb[23].mxu1  ;;  %v1267_v55 = vadd.f32 %v3991_v54, %v5206_v40  ;;  %v4711_v40 = vld [vmem:[%s5785_s9] sm:$0xff]  }
 0x270   : > { %v1779_v5 = vsel %vm1323_vm2, %v4711_v40, 0 }
 0x271   : > { %v1611_v61 = vsel %vm1563_vm3, %v1557_v59, 0  ;;  %4394 = vmatmul.mubr.msk.bf16.vlgmr.msra.gmra.mrb[32].mxu1 %vm1323_vm2, %v1318_v58  ;;  %v1558_v58 = vpack.c.bf16 %v1267_v55, %v1267_v55 }
 0x272   : > { %4404 = vmatpush3.bf16.msra.mxu1 %v1611_v61  ;;  %4405 = vmatprep.mubr.msk.bf16.mxu1 %vm4879_vm1, %v4878_v11 }
 0x273   : > { %4415 = vmatprep.subr.bf16.mxu1 %v4878_v11  ;;  %v1657_v61 = vsel %vm1563_vm3, %v1558_v58, 0 }
 0x274   : > { %v5225_v62 = vpop.f32.mrb[24].mxu1 }
 0x275   : > { %v4371_v63 = vpop.f32.mrb[25].mxu1 }
 0x276   : > { %v1312_v0 = vpop.f32.mrb[26].mxu1 }
 0x277   : > { %v4372_v1 = vpop.f32.mrb[27].mxu1 }
 0x32c   : > { %v1364_v7 = vpop.f32.mrb[20].mxu0 }
 0x32d   : > { %v1365_v8 = vadd.f32 %v1364_v7, %v5228_v6  ;;  %v4377_v9 = vpop.f32.mrb[21].mxu0  ;;  %v1310_v7 = vadd.f32 %v3992_v3, %v5225_v62 }
 0x32e   : > { %v1367_v10 = vpop.f32.mrb[22].mxu0 }
 0x32f   : > { %v4378_v12 = vpop.f32.mrb[23].mxu0  ;;  %v1508_v13 = vsel %vm1323_vm2, %v1365_v8, -inf  ;;  %v4712_v10 = vld [vmem:[%s5785_s9 + $0x8] sm:$0xff]  }
 0x330   : > { %1509 = vmax.xlane.f32.xlu1 %v1508_v13  ;;  %v1559_v12 = vpack.c.bf16 %v1310_v7, %v1310_v7  ;;  %v1782_v62 = vsel %vm1323_vm2, %v4712_v10, 0 }
 0x334   : > { %v1456_v14 = vpop.f32.mrb[24].mxu0 }
 0x335   : > { %v1457_v15 = vadd.f32 %v1456_v14, %v5228_v6  ;;  %v4389_v16 = vpop.f32.mrb[25].mxu0 }
 0x336   : > { %v1459_v17 = vpop.f32.mrb[26].mxu0 }
 0x337   : > { %v4390_v18 = vpop.f32.mrb[27].mxu0  ;;  %v1514_v19 = vsel %vm1323_vm2, %v1457_v15, -inf }
 0x338   : > { %1515 = vmax.xlane.f32.xlu0 %v1514_v19  ;;  %v4713_v19 = vld [vmem:[%s5785_s9 + $0x10] sm:$0xff]  }
 0x33c   : > { %v1410_v20 = vpop.f32.mrb[28].mxu1 }
 0x33d   : > { %v1411_v21 = vadd.f32 %v1410_v20, %v5228_v6  ;;  %v4383_v22 = vpop.f32.mrb[29].mxu1  ;;  %v1838_v20 = vsel %vm1323_vm2, %v4713_v19, 0 }
 0x33e   : > { %v1413_v23 = vpop.f32.mrb[30].mxu1 }
 0x33f   : > { %v4384_v24 = vpop.f32.mrb[31].mxu1  ;;  %v1511_v25 = vsel %vm1323_vm2, %v1411_v21, -inf  ;;  %v4714_v23 = vld [vmem:[%s5785_s9 + $0x20] sm:$0xff]  }
 0x340   : > { %1512 = vmax.xlane.f32.xlu1 %v1511_v25 }
 0x344   : > { %v1502_v26 = vpop.f32.mrb[32].mxu1 }
 0x345   : > { %v1503_v27 = vadd.f32 %v1502_v26, %v5228_v6  ;;  %v4395_v28 = vpop.f32.mrb[33].mxu1 }
 0x346   : > { %v1505_v29 = vpop.f32.mrb[34].mxu1 }
 0x347   : > { %v4396_v30 = vpop.f32.mrb[35].mxu1  ;;  %v1517_v31 = vsel %vm1323_vm2, %v1503_v27, -inf }
 0x348   : > { %1518 = vmax.xlane.f32.xlu1 %v1517_v31  ;;  %v4716_v30 = vld [vmem:[%s5785_s9 + $0x28] sm:$0xff]  }
 0x3bd   : > { %v1510_v32 = vpop.xlane.xlu1 %1509 }
 0x3be   : > { %v1520_v33 = vsub.f32 %v1365_v8, %v1510_v32 }
 0x3c0   : > { %v1524_v34 = vmul.f32 1.442695, %v1520_v33  ;;  %v1900_v33 = vsel %vm1323_vm2, %v4716_v30, 0 }
 0x3c2   : > { %4751 = vpow2.f32 %v1524_v34 }
 0x3c5   : > { %v1516_v35 = vpop.xlane.xlu0 %1515 }
 0x3c6   : > { %v1522_v36 = vsub.f32 %v1457_v15, %v1516_v35  ;;  %v1703_v15 = vsel %vm1563_vm3, %v1559_v12, 0 }
 0x3c8   : > { %v1528_v37 = vmul.f32 1.442695, %v1522_v36  ;;  %v4717_v36 = vld [vmem:[%s5785_s9 + $0x30] sm:$0xff]  }
 0x3ca   : > { %4753 = vpow2.f32 %v1528_v37 }
 0x3cc   : > { %v4752_v38 = vpop.eup %4751 }
 0x3cd   : > { %v1513_v39 = vpop.xlane.xlu1 %1512  ;;  %v1532_v41 = vsel %vm1323_vm2, %v4752_v38, 0.0 }
 0x3ce   : > { %v1521_v42 = vsub.f32 %v1411_v21, %v1513_v39  ;;  %1533 = vadd.xlane.f32.xlu0 %v1532_v41  ;;  %v4715_v21 = vld [vmem:[%s5785_s9 + $0x18] sm:$0xff]  }
 0x3cf   : > { %v1841_v22 = vsel %vm1323_vm2, %v4715_v21, 0 }
 0x3d0   : > { %v1526_v43 = vmul.f32 1.442695, %v1521_v42  ;;  %v1956_v42 = vsel %vm1323_vm2, %v4717_v36, 0  ;;  %v4724_v36 = vld [vmem:[%s5793_s17 + $0x18] sm:$0xff]  }
 0x3d2   : > { %4755 = vpow2.f32 %v1526_v43 }
 0x3d4   : > { %v4754_v44 = vpop.eup %4753 }
 0x3d5   : > { %v1519_v45 = vpop.xlane.xlu1 %1518  ;;  %v1538_v46 = vsel %vm1323_vm2, %v4754_v44, 0.0 }
 0x3d6   : > { %v1523_v47 = vsub.f32 %v1503_v27, %v1519_v45  ;;  %1539 = vadd.xlane.f32.xlu0 %v1538_v46  ;;  %v1897_v27 = vsel %vm1323_vm2, %v4714_v23, 0  ;;  %v4718_v45 = vld [vmem:[%s5785_s9 + $0x38] sm:$0xff]  }
 0x3d8   : > { %v1530_v48 = vmul.f32 1.442695, %v1523_v47 }
 0x3da   : > { %4757 = vpow2.f32 %v1530_v48  ;;  %v1959_v48 = vsel %vm1323_vm2, %v4718_v45, 0 }
 0x3dc   : > { %v4756_v49 = vpop.eup %4755 }
 0x3dd   : > { %v1535_v50 = vsel %vm1323_vm2, %v4756_v49, 0.0 }
 0x3de   : > { %1536 = vadd.xlane.f32.xlu1 %v1535_v50 }
 0x3e4   : > { %v4758_v51 = vpop.eup %4757 }
 0x3e5   : > { %v1541_v52 = vsel %vm1323_vm2, %v4758_v51, 0.0 }
 0x3e6   : > { %1542 = vadd.xlane.f32.xlu1 %v1541_v52 }
 0x45b   : > { %v1534_v53 = vpop.xlane.xlu0 %1533 }
 0x45c   : > { %4759 = vrcp.f32 %v1534_v53 }
 0x463   : > { %v1540_v56 = vpop.xlane.xlu0 %1539 }
 0x464   : > { %4761 = vrcp.f32 %v1540_v56 }
 0x466   : > { %v4760_v57 = vpop.eup %4759 }
 0x467   : > { %v1548_v59 = vmul.f32 %v4760_v57, %v4752_v38 }
 0x469   : > { %v1552_v60 = vpack.c.bf16 %v1548_v59, %v1548_v59 }
 0x46b   : > { %4400 = vmatmul.mubr.msk.bf16.vlgmr.msra.gmra.mrb[28].mxu0 %vm1323_vm2, %v1552_v60  ;;  %v1537_v63 = vpop.xlane.xlu1 %1536 }
 0x46c   : > { %4410 = vmatpush3.bf16.msra.mxu0 %v1657_v61  ;;  %4763 = vrcp.f32 %v1537_v63  ;;  %4411 = vmatprep.mubr.msk.bf16.mxu0 %vm4879_vm1, %v4878_v11 }
 0x46d   : > { %4421 = vmatprep.subr.bf16.mxu0 %v4878_v11 }
 0x46e   : > { %v4762_v0 = vpop.eup %4761 }
 0x46f   : > { %v1550_v1 = vmul.f32 %v4762_v0, %v4754_v44 }
 0x471   : > { %v1554_v4 = vpack.c.bf16 %v1550_v1, %v1550_v1 }
 0x473   : > { %4412 = vmatmul.mubr.msk.bf16.vlgmr.msra.gmra.mrb[32].mxu0 %vm1323_vm2, %v1554_v4  ;;  %v1543_v8 = vpop.xlane.xlu1 %1542 }
 0x474   : > { %4765 = vrcp.f32 %v1543_v8  ;;  %4425 = vmatprep.mubr.msk.bf16.mxu0 %vm4879_vm1, %v4878_v11 }
 0x475   : > { %4422 = vmatpush3.bf16.xpose.msra.mxu0 %v1779_v5 }
 0x476   : > { %v4764_v9 = vpop.eup %4763  ;;  %4423 = vmatprep.subr.bf16.mxu0 %v4878_v11 }
 0x477   : > { %v1549_v13 = vmul.f32 %v4764_v9, %v4756_v49 }
 0x479   : > { %v1553_v14 = vpack.c.bf16 %v1549_v13, %v1549_v13 }
 0x47b   : > { %4406 = vmatmul.mubr.msk.bf16.vlgmr.msra.gmra.mrb[36].mxu1 %vm1323_vm2, %v1553_v14  ;;  %v4017_v14 = vld [vmem:[%s5786_s10] ss:$0 sm:$0xff] }
 0x47c   : > { %4416 = vmatpush3.bf16.msra.mxu1 %v1703_v15  ;;  %4417 = vmatprep.mubr.msk.bf16.mxu1 %vm4879_vm1, %v4878_v11 }
 0x47d   : > { %4424 = vmatpush3.bf16.xpose.msra.mxu0 %v1782_v62  ;;  %4429 = vmatprep.subr.bf16.mxu1 %v4878_v11 }
 0x47e   : > { %v4766_v16 = vpop.eup %4765  ;;  %4437 = vmatprep.subr.bf16.mxu0 %v4878_v11 }
 0x47f   : > { %v1551_v17 = vmul.f32 %v4766_v16, %v4758_v51 }
 0x481   : > { %v1555_v18 = vpack.c.bf16 %v1551_v17, %v1551_v17 }
 0x483   : > { %4418 = vmatmul.mubr.msk.bf16.vlgmr.msra.gmra.mrb[40].mxu1 %vm1323_vm2, %v1555_v18 }
 0x484   : > { %4433 = vmatprep.mubr.msk.bf16.mxu1 %vm4879_vm1, %v4878_v11 }
 0x485   : > { %4430 = vmatpush3.bf16.xpose.msra.mxu1 %v1838_v20 }
 0x486   : > { %4431 = vmatprep.subr.bf16.mxu1 %v4878_v11 }
 0x48d   : > { %4432 = vmatpush3.bf16.xpose.msra.mxu1 %v1841_v22  ;;  %v4719_v22 = vld [vmem:[%s5791_s15] sm:$0xff]  }
 0x48e   : > { %4445 = vmatprep.subr.bf16.mxu1 %v4878_v11 }
 0x53e   : > { %v1601_v24 = vpop.f32.mrb[28].mxu0 }
 0x53f   : > { %v1745_v25 = vpack.c.bf16 %v1601_v24, %v1601_v24  ;;  %v4401_v26 = vpop.f32.mrb[29].mxu0 }
 0x540   : > { %v1604_v28 = vpop.f32.mrb[30].mxu0 }
 0x541   : > { %v4402_v29 = vpop.f32.mrb[31].mxu0  ;;  %4426 = vmatmul.mubr.msk.bf16.vlgmr.msra.gmra.mrb[36].mxu0 %vm1323_vm2, %v1745_v25 }
 0x542   : > { %4438 = vmatpush3.bf16.xpose.msra.mxu0 %v1897_v27  ;;  %4441 = vmatprep.mubr.msk.bf16.mxu0 %vm4879_vm1, %v4878_v11  ;;  %v4018_v27 = vld [vmem:[%s5789_s13] ss:$0 sm:$0xff] }
 0x543   : > { %4439 = vmatprep.subr.bf16.mxu0 %v4878_v11  ;;  %v4019_v29 = vld [vmem:[%s5790_s14] ss:$0 sm:$0xff] }
 0x546   : > { %v1693_v31 = vpop.f32.mrb[32].mxu0 }
 0x547   : > { %v4413_v32 = vpop.f32.mrb[33].mxu0  ;;  %v1747_v38 = vpack.c.bf16 %v1693_v31, %v1693_v31 }
 0x548   : > { %v1696_v34 = vpop.f32.mrb[34].mxu0 }
 0x549   : > { %v4414_v35 = vpop.f32.mrb[35].mxu0  ;;  %v4722_v34 = vld [vmem:[%s5793_s17 + $0x8] sm:$0xff]  }
 0x54a   : > { %4440 = vmatpush3.bf16.xpose.msra.mxu0 %v1900_v33  ;;  %v4721_v33 = vld [vmem:[%s5793_s17] sm:$0xff]   ;;  %v4723_v35 = vld [vmem:[%s5793_s17 + $0x10] sm:$0xff]  }
 0x54b   : > { %4453 = vmatprep.subr.bf16.mxu0 %v4878_v11 }
 0x54e   : > { %v1647_v37 = vpop.f32.mrb[36].mxu1 }
 0x54f   : > { %v1746_v39 = vpack.c.bf16 %v1647_v37, %v1647_v37  ;;  %v4407_v41 = vpop.f32.mrb[37].mxu1  ;;  %v4725_v37 = vld [vmem:[%s5793_s17 + $0x20] sm:$0xff]  }
 0x550   : > { %v1650_v43 = vpop.f32.mrb[38].mxu1  ;;  %v4728_v41 = vld [vmem:[%s5793_s17 + $0x38] sm:$0xff]  }
 0x551   : > { %4442 = vmatmul.mubr.msk.bf16.vlgmr.msra.gmra.mrb[40].mxu0 %vm1323_vm2, %v1747_v38  ;;  %v4408_v44 = vpop.f32.mrb[39].mxu1  ;;  %4434 = vmatmul.mubr.msk.bf16.vlgmr.msra.gmra.mrb[44].mxu1 %vm1323_vm2, %v1746_v39  ;;  %v4726_v38 = vld [vmem:[%s5793_s17 + $0x28] sm:$0xff]   ;;  %v4727_v39 = vld [vmem:[%s5793_s17 + $0x30] sm:$0xff]  }
 0x552   : > { %4446 = vmatpush3.bf16.xpose.msra.mxu1 %v1956_v42  ;;  %4449 = vmatprep.mubr.msk.bf16.mxu1 %vm4879_vm1, %v4878_v11  ;;  %v4020_v42 = vld [vmem:[%s5837_s26] ss:$0 sm:$0xff] }
 0x553   : > { %4447 = vmatprep.subr.bf16.mxu1 %v4878_v11  ;;  %4457 = vmatprep.mubr.msk.bf16.mxu0 %vm4879_vm1, %v4878_v11 }
 0x554   : > { %4454 = vmatpush3.bf16.msra.mxu0 %v4719_v22 }
 0x555   : > { %4455 = vmatprep.subr.bf16.mxu0 %v4878_v11 }
 0x556   : > { %v1739_v46 = vpop.f32.mrb[40].mxu1 }
 0x557   : > { %v4419_v47 = vpop.f32.mrb[41].mxu1  ;;  %v1748_v51 = vpack.c.bf16 %v1739_v46, %v1739_v46 }
 0x558   : > { %v1742_v49 = vpop.f32.mrb[42].mxu1 }
 0x559   : > { %v4420_v50 = vpop.f32.mrb[43].mxu1 }
 0x55a   : > { %4448 = vmatpush3.bf16.xpose.msra.mxu1 %v1959_v48 }
 0x55b   : > { %4461 = vmatprep.subr.bf16.mxu1 %v4878_v11 }
 0x561   : > { %4450 = vmatmul.mubr.msk.bf16.vlgmr.msra.gmra.mrb[48].mxu1 %vm1323_vm2, %v1748_v51 }
 0x562   : > { %4477 = vmatprep.mubr.msk.bf16.mxu1 %vm4879_vm1, %v4878_v11  ;;  %4462 = vmatpush3.bf16.msra.mxu1 %v4721_v33  ;;  %v4057_v33 = vld [vmem:[%s5833_s6 + $0x1c] sm:$0xf] }
 0x563   : > { %4463 = vmatprep.subr.bf16.mxu1 %v4878_v11 }
 0x566   : > { %4464 = vmatpush3.bf16.msra.mxu1 %v4722_v34  ;;  %v2640_v34 = vsel %vm670_vm0, %v4057_v33, 0 }
 0x567   : > { %4465 = vmatprep.subr.bf16.mxu1 %v4878_v11 }
 0x56a   : > { %4466 = vmatpush3.bf16.msra.mxu1 %v4723_v35  ;;  %v4071_v35 = vld [vmem:[%s5834_s29 + $0x14] sm:$0xf] }
 0x56b   : > { %4467 = vmatprep.subr.bf16.mxu1 %v4878_v11 }
 0x56e   : > { %4468 = vmatpush3.bf16.msra.mxu1 %v4724_v36  ;;  %v2760_v36 = vsel %vm670_vm0, %v4071_v35, 0  ;;  %v4047_v35 = vld [vmem:[%s5836_s2 + $0x5] ss:$0 sm:$0xff] }
 0x56f   : > { %4469 = vmatprep.subr.bf16.mxu1 %v4878_v11 }
 0x572   : > { %4470 = vmatpush3.bf16.msra.mxu1 %v4725_v37  ;;  %v4073_v37 = vld [vmem:[%s5834_s29 + $0x1c] sm:$0xf] }
 0x573   : > { %4471 = vmatprep.subr.bf16.mxu1 %v4878_v11 }
 0x576   : > { %4472 = vmatpush3.bf16.msra.mxu1 %v4726_v38  ;;  %v2846_v38 = vsel %vm670_vm0, %v4073_v37, 0  ;;  %v4065_v37 = vld [vmem:[%s5783_s7 + $0x7] ss:$0 sm:$0xff] }
 0x577   : > { %4473 = vmatprep.subr.bf16.mxu1 %v4878_v11 }
 0x57a   : > { %4474 = vmatpush3.bf16.msra.mxu1 %v4727_v39  ;;  %v4062_v39 = vld [vmem:[%s5783_s7 + $0x4] ss:$0 sm:$0xff] }
 0x57b   : > { %4475 = vmatprep.subr.bf16.mxu1 %v4878_v11 }
 0x57e   : > { %4476 = vmatpush3.bf16.msra.mxu1 %v4728_v41 }
 0x57f   : > { %4505 = vmatprep.subr.bf16.mxu1 %v4878_v11 }
 0x614   : > { %v1818_v52 = vpop.f32.mrb[36].mxu0 }
 0x615   : > { %v4427_v53 = vpop.f32.mrb[37].mxu0  ;;  %v2001_v58 = vsel %vm670_vm0, %v1818_v52, 0.0 }
 0x616   : > { %v1821_v54 = vpop.f32.mrb[38].mxu0 }
 0x617   : > { %v4428_v55 = vpop.f32.mrb[39].mxu0 }
 0x624   : > { %v1936_v56 = vpop.f32.mrb[40].mxu0  ;;  %v1877_v57 = vpop.f32.mrb[44].mxu1 }
 0x625   : > { %v2002_v59 = vsel %vm670_vm0, %v1877_v57, 0.0  ;;  %v4443_v60 = vpop.f32.mrb[41].mxu0  ;;  %v4435_v61 = vpop.f32.mrb[45].mxu1  ;;  %v2004_v1 = vsel %vm670_vm0, %v1936_v56, 0.0  ;;  %v4033_v56 = vld [vmem:[%s5794_s18] ss:$0 sm:$0xff] }
 0x626   : > { %v2003_v63 = vadd.f32 %v2002_v59, %v2001_v58  ;;  %v1939_v0 = vpop.f32.mrb[42].mxu0  ;;  %v1880_v40 = vpop.f32.mrb[46].mxu1 }
 0x627   : > { %v4444_v3 = vpop.f32.mrb[43].mxu0  ;;  %v4436_v4 = vpop.f32.mrb[47].mxu1 }
 0x628   : > { %v2005_v5 = vadd.f32 %v2004_v1, %v2003_v63 }
 0x634   : > { %v1995_v7 = vpop.f32.mrb[48].mxu1 }
 0x635   : > { %v2006_v8 = vsel %vm670_vm0, %v1995_v7, 0.0  ;;  %v4451_v9 = vpop.f32.mrb[49].mxu1  ;;  %v4054_v7 = vld [vmem:[%s5833_s6 + $0x10] sm:$0xf] }
 0x636   : > { %v2007_v10 = vadd.f32 %v2006_v8, %v2005_v5  ;;  %v1998_v12 = vpop.f32.mrb[50].mxu1  ;;  %v4038_v5 = vld [vmem:[%s5832_s4 + $0x10] sm:$0xf]  ;;  %v2511_v9 = vsel %vm670_vm0, %v4054_v7, 0  ;;  %v4078_v7 = vld [vmem:[%s5784_s8 + $0x4] ss:$0 sm:$0xff] }
 0x637   : > { %v4452_v13 = vpop.f32.mrb[51].mxu1  ;;  %v2305_v8 = vsel %vm670_vm0, %v4038_v5, 0  ;;  %v4048_v5 = vld [vmem:[%s5836_s2 + $0x6] ss:$0 sm:$0xff] }
 0x638   : > { %v2008_v62 = vadd.f32 %v2007_v10, %v5055_v2  ;;  %v4720_v2 = vld [vmem:[%s5791_s15 + $0x8] sm:$0xff]  }
 0x639   : > { %4456 = vmatpush3.bf16.msra.mxu0 %v4720_v2 }
 0x63a   : > { %v5326_v15 = vadd.f32 %v4017_v14, %v2008_v62  ;;  %4481 = vmatprep.subr.bf16.mxu0 %v4878_v11  ;;  %v4036_v62 = vld [vmem:[%s5787_s11 + $0x1] ss:$0 sm:$0xff] }
 0x63c   : > { %v2019_v16 = vsel %vm670_vm0, %v5326_v15, 0.0 }
 0x63d   : > { %2020 = vadd.xlane.f32.xlu0 %v2019_v16  ;;  %v4037_v16 = vld [vmem:[%s5788_s12 + $0x1] ss:$0 sm:$0xff] }
 0x6ca   : > { %v2021_v17 = vpop.xlane.xlu0 %2020 }
 0x6cb   : > { %v2022_v18 = vmul.f32 0.03125, %v2021_v17 }
 0x6cd   : > { %v2023_v19 = vsub.f32 %v5326_v15, %v2022_v18  ;;  %v4039_v18 = vld [vmem:[%s5832_s4 + $0x14] sm:$0xf] }
 0x6ce   : > { %v2348_v22 = vsel %vm670_vm0, %v4039_v18, 0 }
 0x6cf   : > { %v2024_v20 = vmul.f32 %v2023_v19, %v2023_v19 }
 0x6d1   : > { %v2025_v21 = vsel %vm670_vm0, %v2024_v20, 0.0 }
 0x6d2   : > { %2026 = vadd.xlane.f32.xlu1 %v2025_v21 }
 0x75f   : > { %v2027_v23 = vpop.xlane.xlu1 %2026 }
 0x760   : > { %v2028_v24 = vmul.f32 0.03125, %v2027_v23  ;;  %v4040_v23 = vld [vmem:[%s5832_s4 + $0x18] sm:$0xf] }
 0x762   : > { %v2029_v25 = vadd.f32 1e-05, %v2028_v24  ;;  %v4070_v24 = vld [vmem:[%s5834_s29 + $0x10] sm:$0xf] }
 0x764   : > { %4767 = vrsqrt.f32 %v2029_v25  ;;  %v2391_v25 = vsel %vm670_vm0, %v4040_v23, 0 }
 0x76e   : > { %v4768_v26 = vpop.eup %4767 }
 0x76f   : > { %v2031_v28 = vmul.f32 %v4768_v26, %v2023_v19  ;;  %v4056_v19 = vld [vmem:[%s5833_s6 + $0x18] sm:$0xf]  ;;  %v2717_v26 = vsel %vm670_vm0, %v4070_v24, 0 }
 0x770   : > { %v2597_v2 = vsel %vm670_vm0, %v4056_v19, 0 }
 0x771   : > { %v2038_v30 = vmul.f32 %v4018_v27, %v2031_v28  ;;  %v4041_v27 = vld [vmem:[%s5832_s4 + $0x1c] sm:$0xf]  ;;  %v4072_v28 = vld [vmem:[%s5834_s29 + $0x18] sm:$0xf]  ;;  %s4815_s4 = sshll.u32 %s4880_s16, 4  ;;  %s4816_s4 = int_to_ptr.vmem [resolvable:$false] %s4815_s4 }
 0x772   : > { %p4818_p5 = scmp.lt.s32.totalorder %s5731_s28, %s4816_s4 }
 0x773   : > { %v2045_v31 = vadd.f32 %v4019_v29, %v2038_v30  ;;  %v2434_v29 = vsel %vm670_vm0, %v4041_v27, 0  ;;  %v2803_v30 = vsel %vm670_vm0, %v4072_v28, 0  ;;  %v4063_v28 = vld [vmem:[%s5783_s7 + $0x5] ss:$0 sm:$0xff] }
 0x775   : > { %v2046_v32 = vpack.c.bf16 %v2045_v31, %v2045_v31  ;;  %v4055_v31 = vld [vmem:[%s5833_s6 + $0x14] sm:$0xf]  ;;  %s4817_s6 = scalar_lea.vmem %s4816_s4, 32 }
 0x777   : > { %4458 = vmatmul.mubr.msk.bf16.vlgmr.msra.gmra.mrb[44].mxu0 %vm670_vm0, %v2046_v32  ;;  %v2554_v32 = vsel %vm670_vm0, %v4055_v31, 0 }
 0x778   : > { %4483 = vmatprep.mubr.msk.bf16.mxu0 %vm4879_vm1, %v4878_v11  ;;  %4482 = vmatpush3.bf16.xpose.msra.mxu0 %v2305_v8 }
 0x779   : > { %4487 = vmatprep.subr.bf16.mxu0 %v4878_v11 }
 0x84a   : > { %v2107_v43 = vpop.f32.mrb[44].mxu0 }
 0x84b   : > { %v2108_v44 = vadd.f32 %v4020_v42, %v2107_v43  ;;  %v4459_v45 = vpop.f32.mrb[45].mxu0 }
 0x84c   : > { %v2110_v46 = vpop.f32.mrb[46].mxu0 }
 0x84d   : > { %v4024_v47 = vmul.f32 -1.702, %v2108_v44  ;;  %v4460_v48 = vpop.f32.mrb[47].mxu0 }
 0x84f   : > { %v2115_v49 = vmul.f32 1.442695, %v4024_v47 }
 0x851   : > { %4769 = vpow2.f32 %v2115_v49 }
 0x85b   : > { %v4770_v50 = vpop.eup %4769 }
 0x85c   : > { %v2117_v51 = vadd.f32 1.0, %v4770_v50 }
 0x85e   : > { %4771 = vrcp.f32 %v2117_v51  ;;  %v4046_v51 = vld [vmem:[%s5836_s2 + $0x4] ss:$0 sm:$0xff] }
 0x868   : > { %v4772_v52 = vpop.eup %4771 }
 0x869   : > { %v2120_v53 = vmul.f32 %v4772_v52, %v2108_v44 }
 0x86b   : > { %v2121_v54 = vpack.c.bf16 %v2120_v53, %v2120_v53  ;;  %v4064_v53 = vld [vmem:[%s5783_s7 + $0x6] ss:$0 sm:$0xff] }
 0x86d   : > { %4478 = vmatmul.mubr.bf16.vlgmr.msra.gmra.mrb[52].mxu1 %v2121_v54 }
 0x86e   : > { %4507 = vmatprep.mubr.msk.bf16.mxu1 %vm4879_vm1, %v4878_v11  ;;  %4506 = vmatpush3.bf16.xpose.msra.mxu1 %v2511_v9 }
 0x86f   : > { %4517 = vmatprep.subr.bf16.mxu1 %v4878_v11 }
 0x940   : > { %v2220_v55 = vpop.f32.mrb[52].mxu1 }
 0x941   : > { %v2226_v57 = vadd.f32 %v2220_v55, %v5326_v15  ;;  %v4479_v58 = vpop.f32.mrb[53].mxu1 }
 0x942   : > { %v2223_v59 = vpop.f32.mrb[54].mxu1 }
 0x943   : > { %v5390_v60 = vadd.f32 %v4033_v56, %v2226_v57  ;;  %v4480_v61 = vpop.f32.mrb[55].mxu1 }
 0x945   : > { %v2239_v63 = vsel %vm670_vm0, %v5390_v60, 0.0 }
 0x946   : > { %2240 = vadd.xlane.f32.xlu0 %v2239_v63 }
 0x9d3   : > { %v2241_v0 = vpop.xlane.xlu0 %2240 }
 0x9d4   : > { %v2242_v40 = vmul.f32 0.03125, %v2241_v0 }
 0x9d6   : > { %v2243_v1 = vsub.f32 %v5390_v60, %v2242_v40 }
 0x9d8   : > { %v2244_v3 = vmul.f32 %v2243_v1, %v2243_v1 }
 0x9da   : > { %v2245_v4 = vsel %vm670_vm0, %v2244_v3, 0.0 }
 0x9db   : > { %2246 = vadd.xlane.f32.xlu1 %v2245_v4 }
 0xa68   : > { %v2247_v10 = vpop.xlane.xlu1 %2246 }
 0xa69   : > { %v2248_v12 = vmul.f32 0.03125, %v2247_v10 }
 0xa6b   : > { %v2249_v13 = vadd.f32 1e-05, %v2248_v12 }
 0xa6d   : > { %4773 = vrsqrt.f32 %v2249_v13 }
 0xa77   : > { %v4774_v14 = vpop.eup %4773 }
 0xa78   : > { %v2251_v15 = vmul.f32 %v4774_v14, %v2243_v1 }
 0xa7a   : > { %v2258_v17 = vmul.f32 %v4036_v62, %v2251_v15 }
 0xa7c   : > { %v2265_v20 = vadd.f32 %v4037_v16, %v2258_v17 }
 0xa7e   : > { %v2266_v21 = vpack.c.bf16 %v2265_v20, %v2265_v20 }
 0xa80   : > { %4484 = vmatmul.mubr.msk.bf16.vlgmr.msra.gmra.mrb[48].mxu0 %vm670_vm0, %v2266_v21  ;;  %4508 = vmatmul.mubr.msk.bf16.vlgmr.msra.gmra.mrb[56].mxu1 %vm670_vm0, %v2266_v21 }
 0xa81   : > { %4488 = vmatpush3.bf16.xpose.msra.mxu0 %v2348_v22  ;;  %4518 = vmatpush3.bf16.xpose.msra.mxu1 %v2597_v2 }
 0xa82   : > { %4489 = vmatprep.mubr.msk.bf16.mxu0 %vm4879_vm1, %v4878_v11  ;;  %4519 = vmatprep.mubr.msk.bf16.mxu1 %vm4879_vm1, %v4878_v11 }
 0xa83   : > { %4493 = vmatprep.subr.bf16.mxu0 %v4878_v11  ;;  %4529 = vmatprep.subr.bf16.mxu1 %v4878_v11 }
 0xa88   : > { %4490 = vmatmul.mubr.msk.bf16.vlgmr.msra.gmra.mrb[52].mxu0 %vm670_vm0, %v2266_v21  ;;  %4520 = vmatmul.mubr.msk.bf16.vlgmr.msra.gmra.mrb[60].mxu1 %vm670_vm0, %v2266_v21 }
 0xa89   : > { %4494 = vmatpush3.bf16.xpose.msra.mxu0 %v2391_v25  ;;  %4530 = vmatpush3.bf16.xpose.msra.mxu1 %v2717_v26 }
 0xa8a   : > { %4495 = vmatprep.mubr.msk.bf16.mxu0 %vm4879_vm1, %v4878_v11  ;;  %4531 = vmatprep.mubr.msk.bf16.mxu1 %vm4879_vm1, %v4878_v11 }
 0xa8b   : > { %4499 = vmatprep.subr.bf16.mxu0 %v4878_v11  ;;  %4541 = vmatprep.subr.bf16.mxu1 %v4878_v11 }
 0xa90   : > { %4496 = vmatmul.mubr.msk.bf16.vlgmr.msra.gmra.mrb[56].mxu0 %vm670_vm0, %v2266_v21  ;;  %4532 = vmatmul.mubr.msk.bf16.vlgmr.msra.gmra.mrb[64].mxu1 %vm670_vm0, %v2266_v21 }
 0xa91   : > { %4500 = vmatpush3.bf16.xpose.msra.mxu0 %v2434_v29  ;;  %4542 = vmatpush3.bf16.xpose.msra.mxu1 %v2803_v30 }
 0xa92   : > { %4501 = vmatprep.mubr.msk.bf16.mxu0 %vm4879_vm1, %v4878_v11  ;;  %4543 = vmatprep.mubr.msk.bf16.mxu1 %vm4879_vm1, %v4878_v11 }
 0xa93   : > { %4511 = vmatprep.subr.bf16.mxu0 %v4878_v11  ;;  %4553 = vmatprep.subr.bf16.mxu1 %v4878_v11 }
 0xa98   : > { %4502 = vmatmul.mubr.msk.bf16.vlgmr.msra.gmra.mrb[60].mxu0 %vm670_vm0, %v2266_v21  ;;  %4544 = vmatmul.mubr.msk.bf16.vlgmr.msra.gmra.mrb[68].mxu1 %vm670_vm0, %v2266_v21 }
 0xa99   : > { %4512 = vmatpush3.bf16.xpose.msra.mxu0 %v2554_v32  ;;  %4513 = vmatprep.mubr.msk.bf16.mxu0 %vm4879_vm1, %v4878_v11 }
 0xa9a   : > { %4523 = vmatprep.subr.bf16.mxu0 %v4878_v11  ;;  %4555 = vmatprep.mubr.msk.bf16.mxu1 %vm4879_vm1, %v4878_v11 }
 0xaa0   : > { %4514 = vmatmul.mubr.msk.bf16.vlgmr.msra.gmra.mrb[64].mxu0 %vm670_vm0, %v2266_v21 }
 0xaa1   : > { %4524 = vmatpush3.bf16.xpose.msra.mxu0 %v2640_v34  ;;  %4525 = vmatprep.mubr.msk.bf16.mxu0 %vm4879_vm1, %v4878_v11 }
 0xaa2   : > { %4535 = vmatprep.subr.bf16.mxu0 %v4878_v11 }
 0xaa8   : > { %4526 = vmatmul.mubr.msk.bf16.vlgmr.msra.gmra.mrb[68].mxu0 %vm670_vm0, %v2266_v21 }
 0xaa9   : > { %4536 = vmatpush3.bf16.xpose.msra.mxu0 %v2760_v36  ;;  %4537 = vmatprep.mubr.msk.bf16.mxu0 %vm4879_vm1, %v4878_v11 }
 0xaaa   : > { %4547 = vmatprep.subr.bf16.mxu0 %v4878_v11 }
 0xab0   : > { %4538 = vmatmul.mubr.msk.bf16.vlgmr.msra.gmra.mrb[72].mxu0 %vm670_vm0, %v2266_v21 }
 0xab1   : > { %4548 = vmatpush3.bf16.xpose.msra.mxu0 %v2846_v38  ;;  %4549 = vmatprep.mubr.msk.bf16.mxu0 %vm4879_vm1, %v4878_v11 }
 0xab2   : > { %4559 = vmatprep.subr.bf16.mxu0 %v4878_v11 }
 0xab8   : > { %4550 = vmatmul.mubr.msk.bf16.vlgmr.msra.gmra.mrb[76].mxu0 %vm670_vm0, %v2266_v21 }
 0xab9   : > { %4561 = vmatprep.mubr.msk.bf16.mxu0 %vm4879_vm1, %v4878_v11 }
 0xb53   : > { %v2341_v41 = vpop.f32.mrb[48].mxu0  ;;  %v2547_v42 = vpop.f32.mrb[56].mxu1 }
 0xb54   : > { %v2548_v43 = vadd.f32 %v4062_v39, %v2547_v42  ;;  %v4485_v44 = vpop.f32.mrb[49].mxu0  ;;  %v4509_v45 = vpop.f32.mrb[57].mxu1  ;;  %v2342_v54 = vadd.f32 %v4046_v51, %v2341_v41 }
 0xb55   : > { %v2344_v46 = vpop.f32.mrb[50].mxu0  ;;  %v2550_v47 = vpop.f32.mrb[58].mxu1 }
 0xb56   : > { %v2892_v48 = vpack.c.bf16 %v2548_v43, %v2548_v43  ;;  %v4486_v49 = vpop.f32.mrb[51].mxu0  ;;  %v4510_v50 = vpop.f32.mrb[59].mxu1  ;;  %v2888_v0 = vpack.c.bf16 %v2342_v54, %v2342_v54  ;;  %v4049_v47 = vld [vmem:[%s5836_s2 + $0x7] ss:$0 sm:$0xff] }
 0xb57   : > { %v4079_v49 = vld [vmem:[%s5784_s8 + $0x5] ss:$0 sm:$0xff] }
 0xb58   : > { %v2900_v52 = vsel %vm1323_vm2, %v2892_v48, 0 }
 0xb59   : > { %4554 = vmatpush3.bf16.xpose.msra.mxu1 %v2900_v52 }
 0xb5a   : > { %4565 = vmatprep.subr.bf16.mxu1 %v4878_v11 }
 0xb5b   : > { %v2384_v55 = vpop.f32.mrb[52].mxu0  ;;  %v2633_v56 = vpop.f32.mrb[60].mxu1 }
 0xb5c   : > { %v2634_v57 = vadd.f32 %v4064_v53, %v2633_v56  ;;  %v4491_v58 = vpop.f32.mrb[53].mxu0  ;;  %v4521_v59 = vpop.f32.mrb[61].mxu1  ;;  %v2385_v38 = vadd.f32 %v4047_v35, %v2384_v55 }
 0xb5d   : > { %v2387_v61 = vpop.f32.mrb[54].mxu0  ;;  %v2636_v63 = vpop.f32.mrb[62].mxu1 }
 0xb5e   : > { %v2894_v40 = vpack.c.bf16 %v2634_v57, %v2634_v57  ;;  %v4492_v1 = vpop.f32.mrb[55].mxu0  ;;  %v4522_v3 = vpop.f32.mrb[63].mxu1  ;;  %v2889_v44 = vpack.c.bf16 %v2385_v38, %v2385_v38 }
 0xb60   : > { %v2992_v4 = vsel %vm1323_vm2, %v2894_v40, 0  ;;  %4556 = vmatmul.mubr.msk.bf16.vlgmr.msra.gmra.mrb[72].mxu1 %vm1323_vm2, %v2888_v0 }
 0xb61   : > { %4566 = vmatpush3.bf16.xpose.msra.mxu1 %v2992_v4  ;;  %4567 = vmatprep.mubr.msk.bf16.mxu1 %vm4879_vm1, %v4878_v11 }
 0xb62   : > { %4577 = vmatprep.subr.bf16.mxu1 %v4878_v11 }
 0xb63   : > { %v2427_v8 = vpop.f32.mrb[56].mxu0  ;;  %v2753_v9 = vpop.f32.mrb[64].mxu1 }
 0xb64   : > { %v2428_v10 = vadd.f32 %v4048_v5, %v2427_v8  ;;  %v2754_v12 = vadd.f32 %v4078_v7, %v2753_v9  ;;  %v4497_v13 = vpop.f32.mrb[57].mxu0  ;;  %v4533_v14 = vpop.f32.mrb[65].mxu1 }
 0xb65   : > { %v2430_v62 = vpop.f32.mrb[58].mxu0  ;;  %v2756_v15 = vpop.f32.mrb[66].mxu1 }
 0xb66   : > { %v2890_v16 = vpack.c.bf16 %v2428_v10, %v2428_v10  ;;  %v3128_v17 = vpack.c.bf16 %v2754_v12, %v2754_v12  ;;  %v4498_v18 = vpop.f32.mrb[59].mxu0  ;;  %v4534_v19 = vpop.f32.mrb[67].mxu1 }
 0xb68   : > { %v3136_v20 = vsel %vm1563_vm3, %v3128_v17, 0  ;;  %4568 = vmatmul.mubr.msk.bf16.vlgmr.msra.gmra.mrb[76].mxu1 %vm1323_vm2, %v2890_v16 }
 0xb69   : > { %4578 = vmatpush3.bf16.msra.mxu1 %v3136_v20  ;;  %4579 = vmatprep.mubr.msk.bf16.mxu1 %vm4879_vm1, %v4878_v11 }
 0xb6a   : > { %4589 = vmatprep.subr.bf16.mxu1 %v4878_v11 }
 0xb6b   : > { %v2470_v21 = vpop.f32.mrb[60].mxu0  ;;  %v5525_v22 = vpop.f32.mrb[68].mxu1 }
 0xb6c   : > { %v4503_v2 = vpop.f32.mrb[61].mxu0  ;;  %v4545_v23 = vpop.f32.mrb[69].mxu1  ;;  %v2471_v50 = vadd.f32 %v4049_v47, %v2470_v21  ;;  %v4080_v47 = vld [vmem:[%s5784_s8 + $0x6] ss:$0 sm:$0xff] }
 0xb6d   : > { %v2473_v24 = vpop.f32.mrb[62].mxu0  ;;  %v2842_v25 = vpop.f32.mrb[70].mxu1 }
 0xb6e   : > { %v4504_v26 = vpop.f32.mrb[63].mxu0  ;;  %v4546_v27 = vpop.f32.mrb[71].mxu1  ;;  %v2891_v55 = vpack.c.bf16 %v2471_v50, %v2471_v50 }
 0xb73   : > { %v2590_v29 = vpop.f32.mrb[64].mxu0 }
 0xb74   : > { %v2591_v30 = vadd.f32 %v4063_v28, %v2590_v29  ;;  %v4515_v31 = vpop.f32.mrb[65].mxu0 }
 0xb75   : > { %v2593_v32 = vpop.f32.mrb[66].mxu0 }
 0xb76   : > { %v2893_v33 = vpack.c.bf16 %v2591_v30, %v2591_v30  ;;  %v4516_v34 = vpop.f32.mrb[67].mxu0 }
 0xb78   : > { %v2946_v36 = vsel %vm1323_vm2, %v2893_v33, 0 }
 0xb79   : > { %4560 = vmatpush3.bf16.xpose.msra.mxu0 %v2946_v36 }
 0xb7a   : > { %4571 = vmatprep.subr.bf16.mxu0 %v4878_v11 }
 0xb7b   : > { %v2676_v39 = vpop.f32.mrb[68].mxu0 }
 0xb7c   : > { %v2677_v41 = vadd.f32 %v4065_v37, %v2676_v39  ;;  %v4527_v42 = vpop.f32.mrb[69].mxu0 }
 0xb7d   : > { %v2679_v43 = vpop.f32.mrb[70].mxu0 }
 0xb7e   : > { %v2895_v45 = vpack.c.bf16 %v2677_v41, %v2677_v41  ;;  %v4528_v46 = vpop.f32.mrb[71].mxu0 }
 0xb80   : > { %v3038_v48 = vsel %vm1323_vm2, %v2895_v45, 0  ;;  %4562 = vmatmul.mubr.msk.bf16.vlgmr.msra.gmra.mrb[80].mxu0 %vm1323_vm2, %v2889_v44 }
 0xb81   : > { %4572 = vmatpush3.bf16.xpose.msra.mxu0 %v3038_v48  ;;  %4573 = vmatprep.mubr.msk.bf16.mxu0 %vm4879_vm1, %v4878_v11  ;;  %v2840_v48 = vadd.f32 %v4080_v47, %v5525_v22  ;;  %v4729_v22 = vld [vmem:[%s5785_s9 + $0x40] sm:$0xff]  }
 0xb82   : > { %4583 = vmatprep.subr.bf16.mxu0 %v4878_v11 }
 0xb83   : > { %v2796_v51 = vpop.f32.mrb[72].mxu0 }
 0xb84   : > { %v2797_v52 = vadd.f32 %v4079_v49, %v2796_v51  ;;  %v4539_v53 = vpop.f32.mrb[73].mxu0  ;;  %v3130_v51 = vpack.c.bf16 %v2840_v48, %v2840_v48 }
 0xb85   : > { %v2799_v54 = vpop.f32.mrb[74].mxu0 }
 0xb86   : > { %v3129_v56 = vpack.c.bf16 %v2797_v52, %v2797_v52  ;;  %v4540_v57 = vpop.f32.mrb[75].mxu0  ;;  %v3228_v54 = vsel %vm1563_vm3, %v3130_v51, 0 }
 0xb88   : > { %v3182_v58 = vsel %vm1563_vm3, %v3129_v56, 0  ;;  %4574 = vmatmul.mubr.msk.bf16.vlgmr.msra.gmra.mrb[84].mxu0 %vm1323_vm2, %v2891_v55 }
 0xb89   : > { %4584 = vmatpush3.bf16.msra.mxu0 %v3182_v58  ;;  %4585 = vmatprep.mubr.msk.bf16.mxu0 %vm4879_vm1, %v4878_v11  ;;  %v3351_v58 = vsel %vm1323_vm2, %v4729_v22, 0 }
 0xb8a   : > { %4595 = vmatprep.subr.bf16.mxu0 %v4878_v11 }
 0xb8b   : > { %v5554_v59 = vpop.f32.mrb[76].mxu0 }
 0xb8c   : > { %v4551_v61 = vpop.f32.mrb[77].mxu0 }
 0xb8d   : > { %v2885_v63 = vpop.f32.mrb[78].mxu0  ;;  %v4730_v61 = vld [vmem:[%s5785_s9 + $0x48] sm:$0xff]  }
 0xb8e   : > { %v4552_v0 = vpop.f32.mrb[79].mxu0  ;;  %v3354_v63 = vsel %vm1323_vm2, %v4730_v61, 0 }
 0xc33   : > { %v2936_v40 = vpop.f32.mrb[72].mxu1 }
 0xc34   : > { %v2937_v1 = vadd.f32 %v2936_v40, %v5228_v6  ;;  %v4557_v3 = vpop.f32.mrb[73].mxu1  ;;  %v4081_v40 = vld [vmem:[%s5784_s8 + $0x7] ss:$0 sm:$0xff] }
 0xc35   : > { %v2939_v4 = vpop.f32.mrb[74].mxu1 }
 0xc36   : > { %v4558_v5 = vpop.f32.mrb[75].mxu1  ;;  %v3080_v7 = vsel %vm1323_vm2, %v2937_v1, -inf }
 0xc37   : > { %3081 = vmax.xlane.f32.xlu0 %v3080_v7 }
 0xc3b   : > { %v3028_v8 = vpop.f32.mrb[76].mxu1 }
 0xc3c   : > { %v3029_v9 = vadd.f32 %v3028_v8, %v5228_v6  ;;  %v4569_v10 = vpop.f32.mrb[77].mxu1 }
 0xc3d   : > { %v3031_v12 = vpop.f32.mrb[78].mxu1 }
 0xc3e   : > { %v4570_v13 = vpop.f32.mrb[79].mxu1  ;;  %v3086_v14 = vsel %vm1323_vm2, %v3029_v9, -inf }
 0xc3f   : > { %3087 = vmax.xlane.f32.xlu0 %v3086_v14 }
 0xc53   : > { %v2982_v62 = vpop.f32.mrb[80].mxu0 }
 0xc54   : > { %v2983_v15 = vadd.f32 %v2982_v62, %v5228_v6  ;;  %v4563_v16 = vpop.f32.mrb[81].mxu0  ;;  %v4734_v62 = vld [vmem:[%s5785_s9 + $0x58] sm:$0xff]  }
 0xc55   : > { %v2985_v17 = vpop.f32.mrb[82].mxu0  ;;  %v4731_v16 = vld [vmem:[%s5785_s9 + $0x60] sm:$0xff]  }
 0xc56   : > { %v4564_v18 = vpop.f32.mrb[83].mxu0  ;;  %v3083_v19 = vsel %vm1323_vm2, %v2983_v15, -inf }
 0xc57   : > { %3084 = vmax.xlane.f32.xlu1 %v3083_v19 }
 0xc5b   : > { %v3074_v20 = vpop.f32.mrb[84].mxu0 }
 0xc5c   : > { %v3075_v21 = vadd.f32 %v3074_v20, %v5228_v6  ;;  %v4575_v2 = vpop.f32.mrb[85].mxu0  ;;  %v3469_v20 = vsel %vm1323_vm2, %v4731_v16, 0 }
 0xc5d   : > { %v3077_v23 = vpop.f32.mrb[86].mxu0 }
 0xc5e   : > { %v4576_v24 = vpop.f32.mrb[87].mxu0  ;;  %v3089_v25 = vsel %vm1323_vm2, %v3075_v21, -inf  ;;  %v4732_v23 = vld [vmem:[%s5785_s9 + $0x68] sm:$0xff]  }
 0xc5f   : > { %3090 = vmax.xlane.f32.xlu1 %v3089_v25 }
 0xcc4   : > { %v3082_v26 = vpop.xlane.xlu0 %3081 }
 0xcc5   : > { %v3092_v27 = vsub.f32 %v2937_v1, %v3082_v26  ;;  %v2883_v1 = vadd.f32 %v4081_v40, %v5554_v59  ;;  %v4733_v59 = vld [vmem:[%s5785_s9 + $0x50] sm:$0xff]   ;;  %v3472_v26 = vsel %vm1323_vm2, %v4732_v23, 0 }
 0xcc6   : > { %v3410_v14 = vsel %vm1323_vm2, %v4733_v59, 0 }
 0xcc7   : > { %v3096_v28 = vmul.f32 1.442695, %v3092_v27  ;;  %v3131_v5 = vpack.c.bf16 %v2883_v1, %v2883_v1 }
 0xcc9   : > { %4775 = vpow2.f32 %v3096_v28 }
 0xccc   : > { %v3088_v29 = vpop.xlane.xlu0 %3087 }
 0xccd   : > { %v3094_v30 = vsub.f32 %v3029_v9, %v3088_v29  ;;  %v3274_v9 = vsel %vm1563_vm3, %v3131_v5, 0  ;;  %v4123_v5 = vld [vmem:[%s5786_s10 + $0x1] ss:$0 sm:$0xff] }
 0xccf   : > { %v3100_v31 = vmul.f32 1.442695, %v3094_v30  ;;  %v4735_v30 = vld [vmem:[%s5785_s9 + $0x70] sm:$0xff]  }
 0xcd1   : > { %4777 = vpow2.f32 %v3100_v31 }
 0xcd3   : > { %v4776_v32 = vpop.eup %4775 }
 0xcd4   : > { %v3104_v33 = vsel %vm1323_vm2, %v4776_v32, 0.0 }
 0xcd5   : > { %3105 = vadd.xlane.f32.xlu0 %v3104_v33 }
 0xcdb   : > { %v4778_v34 = vpop.eup %4777 }
 0xcdc   : > { %v3110_v6 = vsel %vm1323_vm2, %v4778_v34, 0.0 }
 0xcdd   : > { %3111 = vadd.xlane.f32.xlu0 %v3110_v6 }
 0xce4   : > { %v3085_v35 = vpop.xlane.xlu1 %3084 }
 0xce5   : > { %v3093_v36 = vsub.f32 %v2983_v15, %v3085_v35  ;;  %v3413_v15 = vsel %vm1323_vm2, %v4734_v62, 0  ;;  %v4737_v62 = vld [vmem:[%s5791_s15 + $0x10] sm:$0xff]  }
 0xce7   : > { %v3098_v37 = vmul.f32 1.442695, %v3093_v36  ;;  %v4736_v36 = vld [vmem:[%s5785_s9 + $0x78] sm:$0xff]  }
 0xce9   : > { %4779 = vpow2.f32 %v3098_v37 }
 0xcec   : > { %v3091_v38 = vpop.xlane.xlu1 %3090 }
 0xced   : > { %v3095_v39 = vsub.f32 %v3075_v21, %v3091_v38 }
 0xcef   : > { %v3102_v41 = vmul.f32 1.442695, %v3095_v39  ;;  %v3531_v39 = vsel %vm1323_vm2, %v4736_v36, 0 }
 0xcf1   : > { %4781 = vpow2.f32 %v3102_v41 }
 0xcf3   : > { %v4780_v42 = vpop.eup %4779 }
 0xcf4   : > { %v3107_v43 = vsel %vm1323_vm2, %v4780_v42, 0.0 }
 0xcf5   : > { %3108 = vadd.xlane.f32.xlu1 %v3107_v43 }
 0xcfb   : > { %v4782_v44 = vpop.eup %4781 }
 0xcfc   : > { %v3113_v45 = vsel %vm1323_vm2, %v4782_v44, 0.0 }
 0xcfd   : > { %3114 = vadd.xlane.f32.xlu1 %v3113_v45 }
 0xd62   : > { %v3106_v46 = vpop.xlane.xlu0 %3105 }
 0xd63   : > { %4783 = vrcp.f32 %v3106_v46 }
 0xd6a   : > { %v3112_v49 = vpop.xlane.xlu0 %3111 }
 0xd6b   : > { %4785 = vrcp.f32 %v3112_v49 }
 0xd6d   : > { %v4784_v50 = vpop.eup %4783 }
 0xd6e   : > { %v3120_v52 = vmul.f32 %v4784_v50, %v4776_v32 }
 0xd70   : > { %v3124_v53 = vpack.c.bf16 %v3120_v52, %v3120_v52 }
 0xd72   : > { %4580 = vmatmul.mubr.msk.bf16.vlgmr.msra.gmra.mrb[80].mxu1 %vm1323_vm2, %v3124_v53 }
 0xd73   : > { %4590 = vmatpush3.bf16.msra.mxu1 %v3228_v54  ;;  %4591 = vmatprep.mubr.msk.bf16.mxu1 %vm4879_vm1, %v4878_v11 }
 0xd74   : > { %4601 = vmatprep.subr.bf16.mxu1 %v4878_v11 }
 0xd75   : > { %v4786_v55 = vpop.eup %4785 }
 0xd76   : > { %v3122_v56 = vmul.f32 %v4786_v55, %v4778_v34  ;;  %v3528_v34 = vsel %vm1323_vm2, %v4735_v30, 0  ;;  %v4744_v30 = vld [vmem:[%s5793_s17 + $0x68] sm:$0xff]  }
 0xd78   : > { %v3126_v57 = vpack.c.bf16 %v3122_v56, %v3122_v56 }
 0xd7a   : > { %4592 = vmatmul.mubr.msk.bf16.vlgmr.msra.gmra.mrb[84].mxu1 %vm1323_vm2, %v3126_v57 }
 0xd7b   : > { %4605 = vmatprep.mubr.msk.bf16.mxu1 %vm4879_vm1, %v4878_v11 }
 0xd7c   : > { %4602 = vmatpush3.bf16.xpose.msra.mxu1 %v3351_v58 }
 0xd7d   : > { %4603 = vmatprep.subr.bf16.mxu1 %v4878_v11 }
 0xd82   : > { %v3109_v0 = vpop.xlane.xlu1 %3108 }
 0xd83   : > { %4787 = vrcp.f32 %v3109_v0 }
 0xd84   : > { %4604 = vmatpush3.bf16.xpose.msra.mxu1 %v3354_v63 }
 0xd85   : > { %4617 = vmatprep.subr.bf16.mxu1 %v4878_v11 }
 0xd8a   : > { %v3115_v3 = vpop.xlane.xlu1 %3114 }
 0xd8b   : > { %4789 = vrcp.f32 %v3115_v3 }
 0xd8d   : > { %v4788_v4 = vpop.eup %4787 }
 0xd8e   : > { %v3121_v7 = vmul.f32 %v4788_v4, %v4780_v42 }
 0xd90   : > { %v3125_v8 = vpack.c.bf16 %v3121_v7, %v3121_v7 }
 0xd92   : > { %4586 = vmatmul.mubr.msk.bf16.vlgmr.msra.gmra.mrb[88].mxu0 %vm1323_vm2, %v3125_v8 }
 0xd93   : > { %4596 = vmatpush3.bf16.msra.mxu0 %v3274_v9  ;;  %4597 = vmatprep.mubr.msk.bf16.mxu0 %vm4879_vm1, %v4878_v11 }
 0xd94   : > { %4609 = vmatprep.subr.bf16.mxu0 %v4878_v11 }
 0xd95   : > { %v4790_v10 = vpop.eup %4789 }
 0xd96   : > { %v3123_v12 = vmul.f32 %v4790_v10, %v4782_v44 }
 0xd98   : > { %v3127_v13 = vpack.c.bf16 %v3123_v12, %v3123_v12 }
 0xd9a   : > { %4598 = vmatmul.mubr.msk.bf16.vlgmr.msra.gmra.mrb[92].mxu0 %vm1323_vm2, %v3127_v13 }
 0xd9b   : > { %4613 = vmatprep.mubr.msk.bf16.mxu0 %vm4879_vm1, %v4878_v11 }
 0xd9c   : > { %4610 = vmatpush3.bf16.xpose.msra.mxu0 %v3410_v14 }
 0xd9d   : > { %4611 = vmatprep.subr.bf16.mxu0 %v4878_v11 }
 0xda4   : > { %4612 = vmatpush3.bf16.xpose.msra.mxu0 %v3413_v15 }
 0xda5   : > { %4625 = vmatprep.subr.bf16.mxu0 %v4878_v11 }
 0xe45   : > { %v3172_v17 = vpop.f32.mrb[80].mxu1 }
 0xe46   : > { %v3316_v18 = vpack.c.bf16 %v3172_v17, %v3172_v17  ;;  %v4581_v19 = vpop.f32.mrb[81].mxu1 }
 0xe47   : > { %v3175_v21 = vpop.f32.mrb[82].mxu1  ;;  %v4126_v19 = vld [vmem:[%s5789_s13 + $0x1] ss:$0 sm:$0xff] }
 0xe48   : > { %v4582_v2 = vpop.f32.mrb[83].mxu1  ;;  %4606 = vmatmul.mubr.msk.bf16.vlgmr.msra.gmra.mrb[88].mxu1 %vm1323_vm2, %v3316_v18  ;;  %v4127_v21 = vld [vmem:[%s5790_s14 + $0x1] ss:$0 sm:$0xff] }
 0xe49   : > { %4618 = vmatpush3.bf16.xpose.msra.mxu1 %v3469_v20  ;;  %4621 = vmatprep.mubr.msk.bf16.mxu1 %vm4879_vm1, %v4878_v11 }
 0xe4a   : > { %4619 = vmatprep.subr.bf16.mxu1 %v4878_v11 }
 0xe4d   : > { %v3264_v24 = vpop.f32.mrb[84].mxu1 }
 0xe4e   : > { %v4593_v25 = vpop.f32.mrb[85].mxu1  ;;  %v3318_v29 = vpack.c.bf16 %v3264_v24, %v3264_v24 }
 0xe4f   : > { %v3267_v27 = vpop.f32.mrb[86].mxu1  ;;  %v4739_v25 = vld [vmem:[%s5793_s17 + $0x40] sm:$0xff]  }
 0xe50   : > { %v4594_v28 = vpop.f32.mrb[87].mxu1  ;;  %v4741_v27 = vld [vmem:[%s5793_s17 + $0x50] sm:$0xff]  }
 0xe51   : > { %4620 = vmatpush3.bf16.xpose.msra.mxu1 %v3472_v26  ;;  %v4740_v26 = vld [vmem:[%s5793_s17 + $0x48] sm:$0xff]   ;;  %v4742_v28 = vld [vmem:[%s5793_s17 + $0x58] sm:$0xff]  }
 0xe52   : > { %4633 = vmatprep.subr.bf16.mxu1 %v4878_v11 }
 0xe58   : > { %4622 = vmatmul.mubr.msk.bf16.vlgmr.msra.gmra.mrb[92].mxu1 %vm1323_vm2, %v3318_v29  ;;  %v4743_v29 = vld [vmem:[%s5793_s17 + $0x60] sm:$0xff]  }
 0xe59   : > { %4637 = vmatprep.mubr.msk.bf16.mxu1 %vm4879_vm1, %v4878_v11  ;;  %4634 = vmatpush3.bf16.msra.mxu1 %v4737_v62 }
 0xe5a   : > { %4635 = vmatprep.subr.bf16.mxu1 %v4878_v11 }
 0xe65   : > { %v3218_v31 = vpop.f32.mrb[88].mxu0 }
 0xe66   : > { %v3317_v32 = vpack.c.bf16 %v3218_v31, %v3218_v31  ;;  %v4587_v33 = vpop.f32.mrb[89].mxu0  ;;  %v4745_v31 = vld [vmem:[%s5793_s17 + $0x70] sm:$0xff]  }
 0xe67   : > { %v3221_v6 = vpop.f32.mrb[90].mxu0  ;;  %v4133_v33 = vld [vmem:[%s5837_s26 + $0x1] ss:$0 sm:$0xff] }
 0xe68   : > { %v4588_v35 = vpop.f32.mrb[91].mxu0  ;;  %4614 = vmatmul.mubr.msk.bf16.vlgmr.msra.gmra.mrb[96].mxu0 %vm1323_vm2, %v3317_v32  ;;  %v4746_v32 = vld [vmem:[%s5793_s17 + $0x78] sm:$0xff]  }
 0xe69   : > { %4626 = vmatpush3.bf16.xpose.msra.mxu0 %v3528_v34  ;;  %4629 = vmatprep.mubr.msk.bf16.mxu0 %vm4879_vm1, %v4878_v11 }
 0xe6a   : > { %4627 = vmatprep.subr.bf16.mxu0 %v4878_v11 }
 0xe6d   : > { %v3310_v37 = vpop.f32.mrb[92].mxu0 }
 0xe6e   : > { %v4599_v38 = vpop.f32.mrb[93].mxu0  ;;  %v3319_v43 = vpack.c.bf16 %v3310_v37, %v3310_v37 }
 0xe6f   : > { %v3313_v41 = vpop.f32.mrb[94].mxu0 }
 0xe70   : > { %v4600_v42 = vpop.f32.mrb[95].mxu0 }
 0xe71   : > { %4628 = vmatpush3.bf16.xpose.msra.mxu0 %v3531_v39 }
 0xe72   : > { %4641 = vmatprep.subr.bf16.mxu0 %v4878_v11 }
 0xe78   : > { %4630 = vmatmul.mubr.msk.bf16.vlgmr.msra.gmra.mrb[100].mxu0 %vm1323_vm2, %v3319_v43 }
 0xe79   : > { %4657 = vmatprep.mubr.msk.bf16.mxu0 %vm4879_vm1, %v4878_v11  ;;  %4642 = vmatpush3.bf16.msra.mxu0 %v4739_v25 }
 0xe7a   : > { %4643 = vmatprep.subr.bf16.mxu0 %v4878_v11 }
 0xe7d   : > { %4644 = vmatpush3.bf16.msra.mxu0 %v4740_v26 }
 0xe7e   : > { %4645 = vmatprep.subr.bf16.mxu0 %v4878_v11 }
 0xe81   : > { %4646 = vmatpush3.bf16.msra.mxu0 %v4741_v27 }
 0xe82   : > { %4647 = vmatprep.subr.bf16.mxu0 %v4878_v11 }
 0xe85   : > { %4648 = vmatpush3.bf16.msra.mxu0 %v4742_v28 }
 0xe86   : > { %4649 = vmatprep.subr.bf16.mxu0 %v4878_v11 }
 0xe89   : > { %4650 = vmatpush3.bf16.msra.mxu0 %v4743_v29 }
 0xe8a   : > { %4651 = vmatprep.subr.bf16.mxu0 %v4878_v11 }
 0xe8d   : > { %4652 = vmatpush3.bf16.msra.mxu0 %v4744_v30 }
 0xe8e   : > { %4653 = vmatprep.subr.bf16.mxu0 %v4878_v11 }
 0xe91   : > { %4654 = vmatpush3.bf16.msra.mxu0 %v4745_v31 }
 0xe92   : > { %4655 = vmatprep.subr.bf16.mxu0 %v4878_v11 }
 0xe95   : > { %4656 = vmatpush3.bf16.msra.mxu0 %v4746_v32 }
 0xf1b   : > { %v3390_v44 = vpop.f32.mrb[88].mxu1 }
 0xf1c   : > { %v4607_v45 = vpop.f32.mrb[89].mxu1  ;;  %v3573_v53 = vsel %vm670_vm0, %v3390_v44, 0.0 }
 0xf1d   : > { %v3393_v46 = vpop.f32.mrb[90].mxu1 }
 0xf1e   : > { %v4608_v47 = vpop.f32.mrb[91].mxu1 }
 0xf1f   : > { %v4163_v47 = vld [vmem:[%s5794_s18 + $0x1] ss:$0 sm:$0xff] }
 0xf2b   : > { %v3508_v48 = vpop.f32.mrb[92].mxu1 }
 0xf2c   : > { %v4623_v49 = vpop.f32.mrb[93].mxu1  ;;  %v3576_v57 = vsel %vm670_vm0, %v3508_v48, 0.0 }
 0xf2d   : > { %v3511_v50 = vpop.f32.mrb[94].mxu1 }
 0xf2e   : > { %v4624_v51 = vpop.f32.mrb[95].mxu1 }
 0xf3b   : > { %v3449_v52 = vpop.f32.mrb[96].mxu0 }
 0xf3c   : > { %v3574_v54 = vsel %vm670_vm0, %v3449_v52, 0.0  ;;  %v4615_v55 = vpop.f32.mrb[97].mxu0 }
 0xf3d   : > { %v3575_v22 = vadd.f32 %v3574_v54, %v3573_v53  ;;  %v3452_v56 = vpop.f32.mrb[98].mxu0 }
 0xf3e   : > { %v4616_v58 = vpop.f32.mrb[99].mxu0 }
 0xf3f   : > { %v3577_v61 = vadd.f32 %v3576_v57, %v3575_v22 }
 0xf4b   : > { %v3567_v63 = vpop.f32.mrb[100].mxu0 }
 0xf4c   : > { %v3578_v0 = vsel %vm670_vm0, %v3567_v63, 0.0  ;;  %v4631_v40 = vpop.f32.mrb[101].mxu0  ;;  %v4748_v63 = vld [vmem:[%s5797_s21 + $0x8] sm:$0xff]  }
 0xf4d   : > { %v3579_v1 = vadd.f32 %v3578_v0, %v3577_v61  ;;  %v3570_v3 = vpop.f32.mrb[102].mxu0  ;;  %v4747_v61 = vld [vmem:[%s5797_s21] sm:$0xff]  }
 0xf4e   : > { %v4632_v4 = vpop.f32.mrb[103].mxu0 }
 0xf4f   : > { %v3580_v7 = vadd.f32 %v3579_v1, %v5390_v60  ;;  %v4738_v60 = vld [vmem:[%s5791_s15 + $0x18] sm:$0xff]   ;;  %v3818_v4 = vld [vmem:[%s5795_s19] sm:$0x1] }
 0xf50   : > { %4636 = vmatpush3.bf16.msra.mxu1 %v4738_v60 }
 0xf51   : > { %v5652_v8 = vadd.f32 %v4123_v5, %v3580_v7  ;;  %4661 = vmatprep.subr.bf16.mxu1 %v4878_v11 }
 0xf53   : > { %v3594_v9 = vsel %vm670_vm0, %v5652_v8, 0.0 }
 0xf54   : > { %3595 = vadd.xlane.f32.xlu0 %v3594_v9 }
 0xfe1   : > { %v3596_v10 = vpop.xlane.xlu0 %3595 }
 0xfe2   : > { %v3597_v12 = vmul.f32 0.03125, %v3596_v10 }
 0xfe4   : > { %v3598_v13 = vsub.f32 %v5652_v8, %v3597_v12 }
 0xfe6   : > { %v3599_v59 = vmul.f32 %v3598_v13, %v3598_v13 }
 0xfe8   : > { %v3600_v14 = vsel %vm670_vm0, %v3599_v59, 0.0 }
 0xfe9   : > { %3601 = vadd.xlane.f32.xlu1 %v3600_v14 }
0x1076   : > { %v3602_v15 = vpop.xlane.xlu1 %3601 }
0x1077   : > { %v3603_v16 = vmul.f32 0.03125, %v3602_v15 }
0x1079   : > { %v3604_v17 = vadd.f32 1e-05, %v3603_v16 }
0x107b   : > { %4791 = vrsqrt.f32 %v3604_v17 }
0x1085   : > { %v4792_v18 = vpop.eup %4791 }
0x1086   : > { %v3606_v20 = vmul.f32 %v4792_v18, %v3598_v13 }
0x1088   : > { %v3613_v2 = vmul.f32 %v4126_v19, %v3606_v20 }
0x108a   : > { %v3620_v23 = vadd.f32 %v4127_v21, %v3613_v2 }
0x108c   : > { %v3621_v24 = vpack.c.bf16 %v3620_v23, %v3620_v23 }
0x108e   : > { %4638 = vmatmul.mubr.msk.bf16.vlgmr.msra.gmra.mrb[96].mxu1 %vm670_vm0, %v3621_v24 }
0x108f   : > { %4665 = vmatprep.mubr.msk.bf16.mxu1 %vm4879_vm1, %v4878_v11  ;;  %4662 = vmatpush3.bf16.msra.mxu1 %v4747_v61 }
0x1090   : > { %4663 = vmatprep.subr.bf16.mxu1 %v4878_v11  ;;  %v3819_v11 = vld [vmem:[%s5796_s20] sm:$0x1] }
0x1093   : > { %4664 = vmatpush3.bf16.msra.mxu1 %v4748_v63 }
0x1161   : > { %v3684_v34 = vpop.f32.mrb[96].mxu1 }
0x1162   : > { %v3685_v6 = vadd.f32 %v4133_v33, %v3684_v34  ;;  %v4639_v35 = vpop.f32.mrb[97].mxu1 }
0x1163   : > { %v3687_v36 = vpop.f32.mrb[98].mxu1 }
0x1164   : > { %v4137_v37 = vmul.f32 -1.702, %v3685_v6  ;;  %v4640_v38 = vpop.f32.mrb[99].mxu1 }
0x1166   : > { %v3692_v39 = vmul.f32 1.442695, %v4137_v37 }
0x1168   : > { %4793 = vpow2.f32 %v3692_v39 }
0x1172   : > { %v4794_v41 = vpop.eup %4793 }
0x1173   : > { %v3694_v42 = vadd.f32 1.0, %v4794_v41 }
0x1175   : > { %4795 = vrcp.f32 %v3694_v42 }
0x117f   : > { %v4796_v43 = vpop.eup %4795 }
0x1180   : > { %v3697_v44 = vmul.f32 %v4796_v43, %v3685_v6 }
0x1182   : > { %v3698_v45 = vpack.c.bf16 %v3697_v44, %v3697_v44 }
0x1184   : > { %4658 = vmatmul.mubr.bf16.vlgmr.msra.gmra.mrb[104].mxu0 %v3698_v45 }
0x1257   : > { %v3798_v46 = vpop.f32.mrb[104].mxu0 }
0x1258   : > { %v3804_v48 = vadd.f32 %v3798_v46, %v5652_v8  ;;  %v4659_v49 = vpop.f32.mrb[105].mxu0 }
0x1259   : > { %v3801_v50 = vpop.f32.mrb[106].mxu0 }
0x125a   : > { %v3813_v51 = vadd.f32 %v4163_v47, %v3804_v48  ;;  %v4660_v52 = vpop.f32.mrb[107].mxu0 }
0x125c   : > { %3814 = vst.msk [vmem:[#allocation2] sm:$0xff] %vm670_vm0, %v3813_v51 }
0x1263   : > { %v3817_v53 = vld [vmem:[%s3816_s25] sm:$0x1]  ;;  %s4811_s25 = scalar_lea.vmem %s5731_s28, 16 }
0x1264   : > { %v3821_v54 = vsel %vm3820_vm5, %v3817_v53, 0.0  ;;  %p4812_p2 = scmp.ne.s32.totalorder %s5731_s28, %s4811_s25  ;;  %p4819_p6 = scmp.lt.s32.totalorder %s4817_s6, %s4811_s25 }
0x1265   : > { %3822 = vadd.xlane.f32.xlu0 %v3821_v54 }
0x1266   : > { %p4813_p3 = pnand %p4812_p2, %p5037_p10  ;;  %p4820_p7 = por %p4819_p6, %p4818_p5 }
0x1268   : > { %p4814_p4 = pneg %p4813_p3 }
0x126a   : > { %p4821_p8 = pnand %p4820_p7, %p4814_p4 }
0x12f2   : > { %v3823_v55 = vpop.xlane.xlu0 %3822 }
0x12f3   : > { %v3824_v22 = vmul.f32 0.03125, %v3823_v55 }
0x12f5   : > { %v3825_v56 = vsub.f32 %v3817_v53, %v3824_v22 }
0x12f7   : > { %v3826_v57 = vmul.f32 %v3825_v56, %v3825_v56 }
0x12f9   : > { %v3827_v58 = vsel %vm3820_vm5, %v3826_v57, 0.0 }
0x12fa   : > { %3828 = vadd.xlane.f32.xlu1 %v3827_v58 }
0x1387   : > { %v3829_v0 = vpop.xlane.xlu1 %3828 }
0x1388   : > { %v3830_v40 = vmul.f32 0.03125, %v3829_v0 }
0x138a   : > { %v3831_v1 = vadd.f32 1e-05, %v3830_v40 }
0x138c   : > { %4797 = vrsqrt.f32 %v3831_v1 }
0x1396   : > { %v4798_v3 = vpop.eup %4797 }
0x1397   : > { %v3833_v5 = vmul.f32 %v4798_v3, %v3825_v56 }
0x1399   : > { %v3834_v7 = vmul.f32 %v3833_v5, %v3818_v4 }
0x139b   : > { %v3835_v8 = vadd.f32 %v3834_v7, %v3819_v11 }
0x139d   : > { %v3836_v9 = vpack.c.bf16 %v3835_v8, %v3835_v8 }
0x139f   : > { %4666 = vmatmul.mubr.msk.bf16.vlgmr.msra.gmra.mrb[100].mxu1 %vm670_vm0, %v3836_v9 }
0x1472   : > { %v3890_v10 = vpop.f32.mrb[100].mxu1 }
0x1473   : > { %3896 = vst [vmem:[%s653_s5] sm:$0x1] %v3890_v10  ;;  %v4667_v12 = vpop.f32.mrb[101].mxu1 }
0x1474   : > { %v3893_v13 = vpop.f32.mrb[102].mxu1 }
0x1475   : > { %4824 = shalt.err (!%p4821_p8)
}
0x1476   : > { %s4825_s2 = scalar_lea.hbm %s5736_s1, 16  ;;  %s4829_s3 = scalar_lea.hbm %s5798_s22, 32 }
0x1477   : > { %p4826_p9 = scmp.ne.s32.totalorder %s5736_s1, %s4825_s2  ;;  %p4830_p0 = scmp.lt.u32.totalorder %s5736_s1, %s5798_s22 }
0x1478   : > { %p4831_p1 = scmp.lt.u32.totalorder %s4829_s3, %s4825_s2  ;;  %p4833_p3 = scmp.lt.u32.totalorder %s4825_s2, %s5736_s1 }
0x1479   : > { %p4827_p12 = pnand %p4826_p9, %p5037_p10 }
0x147a   : > { %p4832_p2 = por %p4831_p1, %p4830_p0 }
0x147b   : > { %p4828_p13 = pneg %p4827_p12 }
0x147c   : > { %p4834_p4 = por %p4833_p3, %p4832_p2 }
0x147e   : > { %p4835_p5 = pnand %p4834_p4, %p4828_p13 }
0x1480   : > { %4838 = shalt.err (!%p4835_p5)
}
0x1481   : > { %4669 = dma.vmem_to_hbm [thread:$0]  (%p5037_p10), %s5731_s28, 16, %s5736_s1, %s3898_s24   ;;  %v4668_v59 = vpop.f32.mrb[103].mxu1 }
0x1482 PF: > { %s5838_s6 = sld [smem:[#allocation11_spill]]  ;;  %s5839_s25 = sld [smem:[#allocation9_spill]] }
0x1488   : > { %p4675_p6 = scmp.ge.s32.totalorder %s5838_s6, 2  ;;  %s3922_s0 = sand.u32 1, %s5839_s25  }
0x1489   : > { %s3923_s5 = scalar_lea.sflag [#allocation6], %s3922_s0 }
0x148a   : > { %p4672_p7 = pnand %p4675_p6, %p5041_p11 }
0x148c   : > { %4858 = dma.done.wait (!%p4672_p7), %s3923_s5, 16  }
0x148d   : > { %4860 = vsyncadd (!%p4672_p7), %s3923_s5, 4294967280  ;;  %s5841_s5 = sld [smem:[#allocation12_spill]]  ;;  %s5842_s2 = sld [smem:[#allocation10_spill]] }
0x148e   : > { %s5843_s1 = sld [smem:[#allocation13_spill]]  ;;  %s5844_s0 = smov %s4867_s23 }
0x1493   : > { %p38_p8 = scmp.ge.s32.totalorder %s5841_s5, 4   ;;  %s5845_s23 = smov %s5842_s2 }
0x1495   :  { %40 = sbr.rel (!%p38_p8) target bundleno = 25 (0x19), region = 156 }
0x149c   :  { %3927 = vsyncpa [#allocation6], 1 }
0x149d   :  { %3929 = vsyncpa [#allocation6 + $0x1], 1 }

</bundles_post_ra>
